<compile_context>
chip_gen: v6e
topology: v6e:2x2x1
jax: 0.10.0
libtpu: 0.0.40
codegen_flags: <defaults>
</compile_context>

<pallas_src>
import jax
import jax.numpy as jnp
from jax.experimental import pallas as pl
from jax.experimental.pallas import tpu as pltpu

# ---- model hyper-parameters (small, consistent with the module) -------------
HIDDEN = 32        # hidden_size
LAYERS = 2         # num_layers
VOCAB = 64         # in_size == out_size (character vocabulary)
VPAD = 128         # decoder output padded to a full lane group
SEQ = 8            # tokens processed per pallas_call (T)


def rnn_seq_kernel(x_ref,          # (T, H)      pre-gathered embedding rows
                   h0_ref,         # (L, H)      initial hidden state
                   wx_ref,         # (L, H, 4H)  input-path packed GRU weights
                   wh_ref,         # (L, H, 4H)  hidden-path packed GRU weights
                   b_ref,          # (L, 4H)     packed GRU biases
                   wd_ref,         # (H, VPAD)   decoder weight (transposed, padded)
                   bd_ref,         # (1, VPAD)   decoder bias (padded)
                   logits_ref,     # out: (T, VPAD) logits slab
                   h_out_ref,      # out: (L, H)    final hidden state
                   y_scr):         # scratch: (T, H) per-layer output slab
    T, H = x_ref.shape
    L = h0_ref.shape[0]

    # nn.Dropout in eval/inference mode is identity.
    x_all = x_ref[...]                                            # (T, H)

    for l in range(L):
        # Batched input-path matmul for the whole sequence (off the serial
        # recurrence chain): (T, H) @ (H, 4H) + bias -> (T, 4H).
        gi = jnp.dot(x_all, wx_ref[l],
                     preferred_element_type=jnp.float32) + b_ref[pl.ds(l, 1), :]
        wh = wh_ref[l]                                            # (H, 4H)
        h = h0_ref[pl.ds(l, 1), :]                                # (1, H) in vregs

        # Serial token recurrence: only h @ Wh + gate math on the chain.
        for t in range(T):
            g = gi[t:t + 1, :] + jnp.dot(h, wh,
                                         preferred_element_type=jnp.float32)
            r = jax.nn.sigmoid(g[:, 0 * H:1 * H])                 # i_r + h_r + b_r
            z = jax.nn.sigmoid(g[:, 1 * H:2 * H])                 # i_z + h_z + b_z
            n = jnp.tanh(g[:, 2 * H:3 * H] + r * g[:, 3 * H:4 * H])
            h = (1.0 - z) * n + z * h                             # (1, H)
            y_scr[pl.ds(t, 1), :] = h

        h_out_ref[pl.ds(l, 1), :] = h
        x_all = y_scr[...]                 # (T, H) feeds next layer / decoder

    # Batched decoder: one (T, H) @ (H, VPAD) matmul + one full-tile store.
    logits_ref[...] = (jnp.dot(x_all, wd_ref[...],
                               preferred_element_type=jnp.float32)
                       + bd_ref[...])


@jax.jit
def rnn_forward(tokens, hidden, emb, w_x, w_h, b_g, w_dec_p, b_dec_p):
    """tokens: (T,) int32; hidden: (L, 1, H) like PyTorch's init_hidden().

    Returns (logits (T, V), hidden' (L, 1, H)); T=1 reproduces a single call
    to the module's forward()."""
    T = tokens.shape[0]
    L, _, H = hidden.shape
    VP = w_dec_p.shape[1]
    h0 = hidden.reshape(L, H)

    # Embedding lookup as a tiny XLA gather in the wrapper (per perf review):
    # avoids T sub-(8,128) per-token DMAs; the kernel gets one dense (T, H) tile.
    x_emb = emb[tokens]                                           # (T, H)

    logits_pad, h_new = pl.pallas_call(
        rnn_seq_kernel,
        out_shape=(jax.ShapeDtypeStruct((T, VP), jnp.float32),
                   jax.ShapeDtypeStruct((L, H), jnp.float32)),
        grid=(1,),
        in_specs=[
            pl.BlockSpec((T, H), lambda i: (0, 0)),
            pl.BlockSpec((L, H), lambda i: (0, 0)),
            pl.BlockSpec((L, H, 4 * H), lambda i: (0, 0, 0)),
            pl.BlockSpec((L, H, 4 * H), lambda i: (0, 0, 0)),
            pl.BlockSpec((L, 4 * H), lambda i: (0, 0)),
            pl.BlockSpec((H, VP), lambda i: (0, 0)),
            pl.BlockSpec((1, VP), lambda i: (0, 0)),
        ],
        out_specs=(pl.BlockSpec((T, VP), lambda i: (0, 0)),
                   pl.BlockSpec((L, H), lambda i: (0, 0))),
        scratch_shapes=[pltpu.VMEM((T, H), jnp.float32)],
        compiler_params=pltpu.CompilerParams(
            dimension_semantics=("arbitrary",)),
    )(x_emb, h0, w_x, w_h, b_g, w_dec_p, b_dec_p)

    return logits_pad[:, :VOCAB], h_new.reshape(L, 1, H)


# -------------------- parameter construction / packing -----------------------
def init_params(key, vocab=VOCAB, hidden=HIDDEN, layers=LAYERS):
    """Raw PyTorch-layout parameters:
       emb (V,H); w_ih/w_hh (L,3H,H) gate order [r,z,n]; b_ih/b_hh (L,3H);
       w_dec (V,H); b_dec (V,)."""
    ks = jax.random.split(key, 8)
    bound = 1.0 / jnp.sqrt(hidden)
    emb = jax.random.normal(ks[0], (vocab, hidden), jnp.float32)
    w_ih = jax.random.uniform(ks[1], (layers, 3 * hidden, hidden), jnp.float32, -bound, bound)
    w_hh = jax.random.uniform(ks[2], (layers, 3 * hidden, hidden), jnp.float32, -bound, bound)
    b_ih = jax.random.uniform(ks[3], (layers, 3 * hidden), jnp.float32, -bound, bound)
    b_hh = jax.random.uniform(ks[4], (layers, 3 * hidden), jnp.float32, -bound, bound)
    w_dec = jax.random.uniform(ks[5], (vocab, hidden), jnp.float32, -bound, bound)
    b_dec = jax.random.uniform(ks[6], (vocab,), jnp.float32, -bound, bound)
    return emb, w_ih, w_hh, b_ih, b_hh, w_dec, b_dec


def pack_params(emb, w_ih, w_hh, b_ih, b_hh, w_dec, b_dec, v_pad=VPAD):
    """Pack raw GRU weights into the split, lane-dense kernel layout."""
    del emb
    L, threeH, H = w_ih.shape
    # (L, gate, out, in) -> transposed per-gate blocks (L, gate, in, out)
    wih_t = jnp.swapaxes(w_ih.reshape(L, 3, H, H), 2, 3)
    whh_t = jnp.swapaxes(w_hh.reshape(L, 3, H, H), 2, 3)
    zero = jnp.zeros((L, H, H), jnp.float32)

    # input path:  [ W_ih_r^T | W_ih_z^T | W_ih_n^T |    0     ]   (L, H, 4H)
    w_x = jnp.concatenate([wih_t[:, 0], wih_t[:, 1], wih_t[:, 2], zero], axis=2)
    # hidden path: [ W_hh_r^T | W_hh_z^T |    0     | W_hh_n^T ]   (L, H, 4H)
    w_h = jnp.concatenate([whh_t[:, 0], whh_t[:, 1], zero, whh_t[:, 2]], axis=2)

    # biases: pre-sum r/z, keep n's input/hidden biases separate (r multiplies h_n path)
    b_g = jnp.concatenate([
        b_ih[:, 0:H] + b_hh[:, 0:H],
        b_ih[:, H:2 * H] + b_hh[:, H:2 * H],
        b_ih[:, 2 * H:3 * H],
        b_hh[:, 2 * H:3 * H],
    ], axis=1)                                                    # (L, 4H)

    V = w_dec.shape[0]
    w_dec_p = jnp.zeros((H, v_pad), jnp.float32).at[:, :V].set(w_dec.T)
    b_dec_p = jnp.zeros((1, v_pad), jnp.float32).at[0, :V].set(b_dec)
    return w_x, w_h, b_g, w_dec_p, b_dec_p


# ------------------------------ pure-JAX reference ----------------------------
def ref_forward(tokens, hidden, emb, w_ih, w_hh, b_ih, b_hh, w_dec, b_dec):
    """Mirrors torch semantics: forward(token_t, hidden) applied sequentially."""
    L, _, H = hidden.shape
    h = [hidden[l] for l in range(L)]                             # each (1, H)
    logits_all = []
    for t in range(tokens.shape[0]):
        x = emb[tokens[t]][None, :]
        for l in range(L):
            gi = x @ w_ih[l].T + b_ih[l]                          # (1, 3H)
            gh = h[l] @ w_hh[l].T + b_hh[l]                       # (1, 3H)
            i_r, i_z, i_n = jnp.split(gi, 3, axis=1)
            h_r, h_z, h_n = jnp.split(gh, 3, axis=1)
            r = jax.nn.sigmoid(i_r + h_r)
            z = jax.nn.sigmoid(i_z + h_z)
            n = jnp.tanh(i_n + r * h_n)
            h[l] = (1.0 - z) * n + z * h[l]
            x = h[l]
        logits_all.append(x @ w_dec.T + b_dec)
    return jnp.concatenate(logits_all, axis=0), jnp.stack(h, axis=0)


if __name__ == "__main__":
    key = jax.random.PRNGKey(0)
    raw = init_params(key)
    emb, w_ih, w_hh, b_ih, b_hh, w_dec, b_dec = raw
    packed = pack_params(*raw)

    tokens = jnp.array([7, 3, 0, 12, 33, 5, 63, 11], dtype=jnp.int32)   # T=8 char ids
    hidden = jnp.zeros((LAYERS, 1, HIDDEN), jnp.float32)                # RNN.init_hidden()

    logits, h_new = rnn_forward(tokens, hidden, emb, *packed)
    logits, h_new = jax.block_until_ready((logits, h_new))

    ref_logits, ref_h = ref_forward(tokens, hidden, emb, w_ih, w_hh, b_ih, b_hh,
                                    w_dec, b_dec)
    assert logits.shape == (SEQ, VOCAB) and h_new.shape == (LAYERS, 1, HIDDEN)
    assert jnp.allclose(logits, ref_logits, rtol=1e-4, atol=1e-4)
    assert jnp.allclose(h_new, ref_h, rtol=1e-4, atol=1e-4)

    print("KERNEL_OK")
</pallas_src>

<mosaic_0001>
module attributes {stable_mosaic.version = 11 : i64} {
  func.func @rnn_seq_kernel(%arg0: i32, %arg1: memref<8x32xf32, #tpu.memory_space<vmem>>, %arg2: memref<2x32xf32, #tpu.memory_space<vmem>>, %arg3: memref<2x32x128xf32, #tpu.memory_space<vmem>>, %arg4: memref<2x32x128xf32, #tpu.memory_space<vmem>>, %arg5: memref<2x128xf32, #tpu.memory_space<vmem>>, %arg6: memref<32x128xf32, #tpu.memory_space<vmem>>, %arg7: memref<1x128xf32, #tpu.memory_space<vmem>>, %arg8: memref<8x128xf32, #tpu.memory_space<vmem>>, %arg9: memref<2x32xf32, #tpu.memory_space<vmem>>, %arg10: memref<8x32xf32, #tpu.memory_space<vmem>>) attributes {dimension_semantics = [#tpu.dimension_semantics<arbitrary>], iteration_bounds = array<i64: 1>, scalar_prefetch = 0 : i64, scratch_operands = 1 : i64, tpu.core_type = #tpu.core_type<tc>, window_params = [{pipeline_mode = #tpu.pipeline_mode<synchronous>, transform_indices = @transform_0, window_bounds = array<i64: 8, 32>}, {pipeline_mode = #tpu.pipeline_mode<synchronous>, transform_indices = @transform_1, window_bounds = array<i64: 2, 32>}, {pipeline_mode = #tpu.pipeline_mode<synchronous>, transform_indices = @transform_2, window_bounds = array<i64: 2, 32, 128>}, {pipeline_mode = #tpu.pipeline_mode<synchronous>, transform_indices = @transform_3, window_bounds = array<i64: 2, 32, 128>}, {pipeline_mode = #tpu.pipeline_mode<synchronous>, transform_indices = @transform_4, window_bounds = array<i64: 2, 128>}, {pipeline_mode = #tpu.pipeline_mode<synchronous>, transform_indices = @transform_5, window_bounds = array<i64: 32, 128>}, {pipeline_mode = #tpu.pipeline_mode<synchronous>, transform_indices = @transform_6, window_bounds = array<i64: 1, 128>}, {pipeline_mode = #tpu.pipeline_mode<synchronous>, transform_indices = @transform_7, window_bounds = array<i64: 8, 128>}, {pipeline_mode = #tpu.pipeline_mode<synchronous>, transform_indices = @transform_8, window_bounds = array<i64: 2, 32>}]} {
    %c0 = arith.constant 0 : index
    %c0_0 = arith.constant 0 : index
    %0 = vector.load %arg1[%c0, %c0_0] : memref<8x32xf32, #tpu.memory_space<vmem>>, vector<8x32xf32>
    %c0_1 = arith.constant 0 : index
    %c0_2 = arith.constant 0 : index
    %c0_3 = arith.constant 0 : index
    %1 = vector.load %arg3[%c0_1, %c0_2, %c0_3] : memref<2x32x128xf32, #tpu.memory_space<vmem>>, vector<1x32x128xf32>
    %2 = vector.shape_cast %1 : vector<1x32x128xf32> to vector<32x128xf32>
    %cst = arith.constant dense<0.000000e+00> : vector<8x128xf32>
    %3 = tpu.matmul %0, %2, %cst {dimension_numbers = #tpu.dot_dimension_numbers<[1], [0], [0], [1], [0, 0, 1, 1], [], []>} : vector<8x32xf32>, vector<32x128xf32>, vector<8x128xf32> -> vector<8x128xf32>
    %c0_4 = arith.constant 0 : index
    %c0_5 = arith.constant 0 : index
    %4 = vector.load %arg5[%c0_4, %c0_5] : memref<2x128xf32, #tpu.memory_space<vmem>>, vector<1x128xf32>
    %5 = vector.broadcast %4 : vector<1x128xf32> to vector<8x128xf32>
    %6 = arith.addf %3, %5 : vector<8x128xf32>
    %c0_6 = arith.constant 0 : index
    %c0_7 = arith.constant 0 : index
    %c0_8 = arith.constant 0 : index
    %7 = vector.load %arg4[%c0_6, %c0_7, %c0_8] : memref<2x32x128xf32, #tpu.memory_space<vmem>>, vector<1x32x128xf32>
    %8 = vector.shape_cast %7 : vector<1x32x128xf32> to vector<32x128xf32>
    %c0_9 = arith.constant 0 : index
    %c0_10 = arith.constant 0 : index
    %9 = vector.load %arg2[%c0_9, %c0_10] : memref<2x32xf32, #tpu.memory_space<vmem>>, vector<1x32xf32>
    %10 = vector.extract_strided_slice %6 {offsets = [0, 0], sizes = [1, 128], strides = [1, 1]} : vector<8x128xf32> to vector<1x128xf32>
    %cst_11 = arith.constant dense<0.000000e+00> : vector<1x128xf32>
    %11 = tpu.matmul %9, %8, %cst_11 {dimension_numbers = #tpu.dot_dimension_numbers<[1], [0], [0], [1], [0, 0, 1, 1], [], []>} : vector<1x32xf32>, vector<32x128xf32>, vector<1x128xf32> -> vector<1x128xf32>
    %12 = arith.addf %10, %11 : vector<1x128xf32>
    %13 = vector.extract_strided_slice %12 {offsets = [0, 0], sizes = [1, 32], strides = [1, 1]} : vector<1x128xf32> to vector<1x32xf32>
    %14 = arith.negf %13 : vector<1x32xf32>
    %15 = math.exp %14 : vector<1x32xf32>
    %cst_12 = arith.constant 1.000000e+00 : f32
    %16 = vector.broadcast %cst_12 : f32 to vector<1x32xf32>
    %17 = arith.addf %16, %15 : vector<1x32xf32>
    %18 = arith.divf %16, %17 : vector<1x32xf32>
    %19 = vector.extract_strided_slice %12 {offsets = [0, 32], sizes = [1, 32], strides = [1, 1]} : vector<1x128xf32> to vector<1x32xf32>
    %20 = arith.negf %19 : vector<1x32xf32>
    %21 = math.exp %20 : vector<1x32xf32>
    %cst_13 = arith.constant 1.000000e+00 : f32
    %22 = vector.broadcast %cst_13 : f32 to vector<1x32xf32>
    %23 = arith.addf %22, %21 : vector<1x32xf32>
    %24 = arith.divf %22, %23 : vector<1x32xf32>
    %25 = vector.extract_strided_slice %12 {offsets = [0, 64], sizes = [1, 32], strides = [1, 1]} : vector<1x128xf32> to vector<1x32xf32>
    %26 = vector.extract_strided_slice %12 {offsets = [0, 96], sizes = [1, 32], strides = [1, 1]} : vector<1x128xf32> to vector<1x32xf32>
    %27 = arith.mulf %18, %26 : vector<1x32xf32>
    %28 = arith.addf %25, %27 : vector<1x32xf32>
    %29 = math.tanh %28 : vector<1x32xf32>
    %cst_14 = arith.constant 1.000000e+00 : f32
    %30 = vector.broadcast %cst_14 : f32 to vector<1x32xf32>
    %31 = arith.subf %30, %24 : vector<1x32xf32>
    %32 = arith.mulf %31, %29 : vector<1x32xf32>
    %33 = arith.mulf %24, %9 : vector<1x32xf32>
    %34 = arith.addf %32, %33 : vector<1x32xf32>
    %c0_15 = arith.constant 0 : index
    %c0_16 = arith.constant 0 : index
    %35 = vector.load %arg10[%c0_15, %c0_16] : memref<8x32xf32, #tpu.memory_space<vmem>>, vector<1x32xf32>
    tpu.vector_store %arg10[%c0_15, %c0_16], %34 {strides = array<i32>} : memref<8x32xf32, #tpu.memory_space<vmem>>, vector<1x32xf32>,
    %36 = vector.extract_strided_slice %6 {offsets = [1, 0], sizes = [1, 128], strides = [1, 1]} : vector<8x128xf32> to vector<1x128xf32>
    %cst_17 = arith.constant dense<0.000000e+00> : vector<1x128xf32>
    %37 = tpu.matmul %34, %8, %cst_17 {dimension_numbers = #tpu.dot_dimension_numbers<[1], [0], [0], [1], [0, 0, 1, 1], [], []>} : vector<1x32xf32>, vector<32x128xf32>, vector<1x128xf32> -> vector<1x128xf32>
    %38 = arith.addf %36, %37 : vector<1x128xf32>
    %39 = vector.extract_strided_slice %38 {offsets = [0, 0], sizes = [1, 32], strides = [1, 1]} : vector<1x128xf32> to vector<1x32xf32>
    %40 = arith.negf %39 : vector<1x32xf32>
    %41 = math.exp %40 : vector<1x32xf32>
    %cst_18 = arith.constant 1.000000e+00 : f32
    %42 = vector.broadcast %cst_18 : f32 to vector<1x32xf32>
    %43 = arith.addf %42, %41 : vector<1x32xf32>
    %44 = arith.divf %42, %43 : vector<1x32xf32>
    %45 = vector.extract_strided_slice %38 {offsets = [0, 32], sizes = [1, 32], strides = [1, 1]} : vector<1x128xf32> to vector<1x32xf32>
    %46 = arith.negf %45 : vector<1x32xf32>
    %47 = math.exp %46 : vector<1x32xf32>
    %cst_19 = arith.constant 1.000000e+00 : f32
    %48 = vector.broadcast %cst_19 : f32 to vector<1x32xf32>
    %49 = arith.addf %48, %47 : vector<1x32xf32>
    %50 = arith.divf %48, %49 : vector<1x32xf32>
    %51 = vector.extract_strided_slice %38 {offsets = [0, 64], sizes = [1, 32], strides = [1, 1]} : vector<1x128xf32> to vector<1x32xf32>
    %52 = vector.extract_strided_slice %38 {offsets = [0, 96], sizes = [1, 32], strides = [1, 1]} : vector<1x128xf32> to vector<1x32xf32>
    %53 = arith.mulf %44, %52 : vector<1x32xf32>
    %54 = arith.addf %51, %53 : vector<1x32xf32>
    %55 = math.tanh %54 : vector<1x32xf32>
    %cst_20 = arith.constant 1.000000e+00 : f32
    %56 = vector.broadcast %cst_20 : f32 to vector<1x32xf32>
    %57 = arith.subf %56, %50 : vector<1x32xf32>
    %58 = arith.mulf %57, %55 : vector<1x32xf32>
    %59 = arith.mulf %50, %34 : vector<1x32xf32>
    %60 = arith.addf %58, %59 : vector<1x32xf32>
    %c1 = arith.constant 1 : index
    %c0_21 = arith.constant 0 : index
    %61 = vector.load %arg10[%c1, %c0_21] : memref<8x32xf32, #tpu.memory_space<vmem>>, vector<1x32xf32>
    tpu.vector_store %arg10[%c1, %c0_21], %60 {strides = array<i32>} : memref<8x32xf32, #tpu.memory_space<vmem>>, vector<1x32xf32>,
    %62 = vector.extract_strided_slice %6 {offsets = [2, 0], sizes = [1, 128], strides = [1, 1]} : vector<8x128xf32> to vector<1x128xf32>
    %cst_22 = arith.constant dense<0.000000e+00> : vector<1x128xf32>
    %63 = tpu.matmul %60, %8, %cst_22 {dimension_numbers = #tpu.dot_dimension_numbers<[1], [0], [0], [1], [0, 0, 1, 1], [], []>} : vector<1x32xf32>, vector<32x128xf32>, vector<1x128xf32> -> vector<1x128xf32>
    %64 = arith.addf %62, %63 : vector<1x128xf32>
    %65 = vector.extract_strided_slice %64 {offsets = [0, 0], sizes = [1, 32], strides = [1, 1]} : vector<1x128xf32> to vector<1x32xf32>
    %66 = arith.negf %65 : vector<1x32xf32>
    %67 = math.exp %66 : vector<1x32xf32>
    %cst_23 = arith.constant 1.000000e+00 : f32
    %68 = vector.broadcast %cst_23 : f32 to vector<1x32xf32>
    %69 = arith.addf %68, %67 : vector<1x32xf32>
    %70 = arith.divf %68, %69 : vector<1x32xf32>
    %71 = vector.extract_strided_slice %64 {offsets = [0, 32], sizes = [1, 32], strides = [1, 1]} : vector<1x128xf32> to vector<1x32xf32>
    %72 = arith.negf %71 : vector<1x32xf32>
    %73 = math.exp %72 : vector<1x32xf32>
    %cst_24 = arith.constant 1.000000e+00 : f32
    %74 = vector.broadcast %cst_24 : f32 to vector<1x32xf32>
    %75 = arith.addf %74, %73 : vector<1x32xf32>
    %76 = arith.divf %74, %75 : vector<1x32xf32>
    %77 = vector.extract_strided_slice %64 {offsets = [0, 64], sizes = [1, 32], strides = [1, 1]} : vector<1x128xf32> to vector<1x32xf32>
    %78 = vector.extract_strided_slice %64 {offsets = [0, 96], sizes = [1, 32], strides = [1, 1]} : vector<1x128xf32> to vector<1x32xf32>
    %79 = arith.mulf %70, %78 : vector<1x32xf32>
    %80 = arith.addf %77, %79 : vector<1x32xf32>
    %81 = math.tanh %80 : vector<1x32xf32>
    %cst_25 = arith.constant 1.000000e+00 : f32
    %82 = vector.broadcast %cst_25 : f32 to vector<1x32xf32>
    %83 = arith.subf %82, %76 : vector<1x32xf32>
    %84 = arith.mulf %83, %81 : vector<1x32xf32>
    %85 = arith.mulf %76, %60 : vector<1x32xf32>
    %86 = arith.addf %84, %85 : vector<1x32xf32>
    %c2 = arith.constant 2 : index
    %c0_26 = arith.constant 0 : index
    %87 = vector.load %arg10[%c2, %c0_26] : memref<8x32xf32, #tpu.memory_space<vmem>>, vector<1x32xf32>
    tpu.vector_store %arg10[%c2, %c0_26], %86 {strides = array<i32>} : memref<8x32xf32, #tpu.memory_space<vmem>>, vector<1x32xf32>,
    %88 = vector.extract_strided_slice %6 {offsets = [3, 0], sizes = [1, 128], strides = [1, 1]} : vector<8x128xf32> to vector<1x128xf32>
    %cst_27 = arith.constant dense<0.000000e+00> : vector<1x128xf32>
    %89 = tpu.matmul %86, %8, %cst_27 {dimension_numbers = #tpu.dot_dimension_numbers<[1], [0], [0], [1], [0, 0, 1, 1], [], []>} : vector<1x32xf32>, vector<32x128xf32>, vector<1x128xf32> -> vector<1x128xf32>
    %90 = arith.addf %88, %89 : vector<1x128xf32>
    %91 = vector.extract_strided_slice %90 {offsets = [0, 0], sizes = [1, 32], strides = [1, 1]} : vector<1x128xf32> to vector<1x32xf32>
    %92 = arith.negf %91 : vector<1x32xf32>
    %93 = math.exp %92 : vector<1x32xf32>
    %cst_28 = arith.constant 1.000000e+00 : f32
    %94 = vector.broadcast %cst_28 : f32 to vector<1x32xf32>
    %95 = arith.addf %94, %93 : vector<1x32xf32>
    %96 = arith.divf %94, %95 : vector<1x32xf32>
    %97 = vector.extract_strided_slice %90 {offsets = [0, 32], sizes = [1, 32], strides = [1, 1]} : vector<1x128xf32> to vector<1x32xf32>
    %98 = arith.negf %97 : vector<1x32xf32>
    %99 = math.exp %98 : vector<1x32xf32>
    %cst_29 = arith.constant 1.000000e+00 : f32
    %100 = vector.broadcast %cst_29 : f32 to vector<1x32xf32>
    %101 = arith.addf %100, %99 : vector<1x32xf32>
    %102 = arith.divf %100, %101 : vector<1x32xf32>
    %103 = vector.extract_strided_slice %90 {offsets = [0, 64], sizes = [1, 32], strides = [1, 1]} : vector<1x128xf32> to vector<1x32xf32>
    %104 = vector.extract_strided_slice %90 {offsets = [0, 96], sizes = [1, 32], strides = [1, 1]} : vector<1x128xf32> to vector<1x32xf32>
    %105 = arith.mulf %96, %104 : vector<1x32xf32>
    %106 = arith.addf %103, %105 : vector<1x32xf32>
    %107 = math.tanh %106 : vector<1x32xf32>
    %cst_30 = arith.constant 1.000000e+00 : f32
    %108 = vector.broadcast %cst_30 : f32 to vector<1x32xf32>
    %109 = arith.subf %108, %102 : vector<1x32xf32>
    %110 = arith.mulf %109, %107 : vector<1x32xf32>
    %111 = arith.mulf %102, %86 : vector<1x32xf32>
    %112 = arith.addf %110, %111 : vector<1x32xf32>
    %c3 = arith.constant 3 : index
    %c0_31 = arith.constant 0 : index
    %113 = vector.load %arg10[%c3, %c0_31] : memref<8x32xf32, #tpu.memory_space<vmem>>, vector<1x32xf32>
    tpu.vector_store %arg10[%c3, %c0_31], %112 {strides = array<i32>} : memref<8x32xf32, #tpu.memory_space<vmem>>, vector<1x32xf32>,
    %114 = vector.extract_strided_slice %6 {offsets = [4, 0], sizes = [1, 128], strides = [1, 1]} : vector<8x128xf32> to vector<1x128xf32>
    %cst_32 = arith.constant dense<0.000000e+00> : vector<1x128xf32>
    %115 = tpu.matmul %112, %8, %cst_32 {dimension_numbers = #tpu.dot_dimension_numbers<[1], [0], [0], [1], [0, 0, 1, 1], [], []>} : vector<1x32xf32>, vector<32x128xf32>, vector<1x128xf32> -> vector<1x128xf32>
    %116 = arith.addf %114, %115 : vector<1x128xf32>
    %117 = vector.extract_strided_slice %116 {offsets = [0, 0], sizes = [1, 32], strides = [1, 1]} : vector<1x128xf32> to vector<1x32xf32>
    %118 = arith.negf %117 : vector<1x32xf32>
    %119 = math.exp %118 : vector<1x32xf32>
    %cst_33 = arith.constant 1.000000e+00 : f32
    %120 = vector.broadcast %cst_33 : f32 to vector<1x32xf32>
    %121 = arith.addf %120, %119 : vector<1x32xf32>
    %122 = arith.divf %120, %121 : vector<1x32xf32>
    %123 = vector.extract_strided_slice %116 {offsets = [0, 32], sizes = [1, 32], strides = [1, 1]} : vector<1x128xf32> to vector<1x32xf32>
    %124 = arith.negf %123 : vector<1x32xf32>
    %125 = math.exp %124 : vector<1x32xf32>
    %cst_34 = arith.constant 1.000000e+00 : f32
    %126 = vector.broadcast %cst_34 : f32 to vector<1x32xf32>
    %127 = arith.addf %126, %125 : vector<1x32xf32>
    %128 = arith.divf %126, %127 : vector<1x32xf32>
    %129 = vector.extract_strided_slice %116 {offsets = [0, 64], sizes = [1, 32], strides = [1, 1]} : vector<1x128xf32> to vector<1x32xf32>
    %130 = vector.extract_strided_slice %116 {offsets = [0, 96], sizes = [1, 32], strides = [1, 1]} : vector<1x128xf32> to vector<1x32xf32>
    %131 = arith.mulf %122, %130 : vector<1x32xf32>
    %132 = arith.addf %129, %131 : vector<1x32xf32>
    %133 = math.tanh %132 : vector<1x32xf32>
    %cst_35 = arith.constant 1.000000e+00 : f32
    %134 = vector.broadcast %cst_35 : f32 to vector<1x32xf32>
    %135 = arith.subf %134, %128 : vector<1x32xf32>
    %136 = arith.mulf %135, %133 : vector<1x32xf32>
    %137 = arith.mulf %128, %112 : vector<1x32xf32>
    %138 = arith.addf %136, %137 : vector<1x32xf32>
    %c4 = arith.constant 4 : index
    %c0_36 = arith.constant 0 : index
    %139 = vector.load %arg10[%c4, %c0_36] : memref<8x32xf32, #tpu.memory_space<vmem>>, vector<1x32xf32>
    tpu.vector_store %arg10[%c4, %c0_36], %138 {strides = array<i32>} : memref<8x32xf32, #tpu.memory_space<vmem>>, vector<1x32xf32>,
    %140 = vector.extract_strided_slice %6 {offsets = [5, 0], sizes = [1, 128], strides = [1, 1]} : vector<8x128xf32> to vector<1x128xf32>
    %cst_37 = arith.constant dense<0.000000e+00> : vector<1x128xf32>
    %141 = tpu.matmul %138, %8, %cst_37 {dimension_numbers = #tpu.dot_dimension_numbers<[1], [0], [0], [1], [0, 0, 1, 1], [], []>} : vector<1x32xf32>, vector<32x128xf32>, vector<1x128xf32> -> vector<1x128xf32>
    %142 = arith.addf %140, %141 : vector<1x128xf32>
    %143 = vector.extract_strided_slice %142 {offsets = [0, 0], sizes = [1, 32], strides = [1, 1]} : vector<1x128xf32> to vector<1x32xf32>
    %144 = arith.negf %143 : vector<1x32xf32>
    %145 = math.exp %144 : vector<1x32xf32>
    %cst_38 = arith.constant 1.000000e+00 : f32
    %146 = vector.broadcast %cst_38 : f32 to vector<1x32xf32>
    %147 = arith.addf %146, %145 : vector<1x32xf32>
    %148 = arith.divf %146, %147 : vector<1x32xf32>
    %149 = vector.extract_strided_slice %142 {offsets = [0, 32], sizes = [1, 32], strides = [1, 1]} : vector<1x128xf32> to vector<1x32xf32>
    %150 = arith.negf %149 : vector<1x32xf32>
    %151 = math.exp %150 : vector<1x32xf32>
    %cst_39 = arith.constant 1.000000e+00 : f32
    %152 = vector.broadcast %cst_39 : f32 to vector<1x32xf32>
    %153 = arith.addf %152, %151 : vector<1x32xf32>
    %154 = arith.divf %152, %153 : vector<1x32xf32>
    %155 = vector.extract_strided_slice %142 {offsets = [0, 64], sizes = [1, 32], strides = [1, 1]} : vector<1x128xf32> to vector<1x32xf32>
    %156 = vector.extract_strided_slice %142 {offsets = [0, 96], sizes = [1, 32], strides = [1, 1]} : vector<1x128xf32> to vector<1x32xf32>
    %157 = arith.mulf %148, %156 : vector<1x32xf32>
    %158 = arith.addf %155, %157 : vector<1x32xf32>
    %159 = math.tanh %158 : vector<1x32xf32>
    %cst_40 = arith.constant 1.000000e+00 : f32
    %160 = vector.broadcast %cst_40 : f32 to vector<1x32xf32>
    %161 = arith.subf %160, %154 : vector<1x32xf32>
    %162 = arith.mulf %161, %159 : vector<1x32xf32>
    %163 = arith.mulf %154, %138 : vector<1x32xf32>
    %164 = arith.addf %162, %163 : vector<1x32xf32>
    %c5 = arith.constant 5 : index
    %c0_41 = arith.constant 0 : index
    %165 = vector.load %arg10[%c5, %c0_41] : memref<8x32xf32, #tpu.memory_space<vmem>>, vector<1x32xf32>
    tpu.vector_store %arg10[%c5, %c0_41], %164 {strides = array<i32>} : memref<8x32xf32, #tpu.memory_space<vmem>>, vector<1x32xf32>,
    %166 = vector.extract_strided_slice %6 {offsets = [6, 0], sizes = [1, 128], strides = [1, 1]} : vector<8x128xf32> to vector<1x128xf32>
    %cst_42 = arith.constant dense<0.000000e+00> : vector<1x128xf32>
    %167 = tpu.matmul %164, %8, %cst_42 {dimension_numbers = #tpu.dot_dimension_numbers<[1], [0], [0], [1], [0, 0, 1, 1], [], []>} : vector<1x32xf32>, vector<32x128xf32>, vector<1x128xf32> -> vector<1x128xf32>
    %168 = arith.addf %166, %167 : vector<1x128xf32>
    %169 = vector.extract_strided_slice %168 {offsets = [0, 0], sizes = [1, 32], strides = [1, 1]} : vector<1x128xf32> to vector<1x32xf32>
    %170 = arith.negf %169 : vector<1x32xf32>
    %171 = math.exp %170 : vector<1x32xf32>
    %cst_43 = arith.constant 1.000000e+00 : f32
    %172 = vector.broadcast %cst_43 : f32 to vector<1x32xf32>
    %173 = arith.addf %172, %171 : vector<1x32xf32>
    %174 = arith.divf %172, %173 : vector<1x32xf32>
    %175 = vector.extract_strided_slice %168 {offsets = [0, 32], sizes = [1, 32], strides = [1, 1]} : vector<1x128xf32> to vector<1x32xf32>
    %176 = arith.negf %175 : vector<1x32xf32>
    %177 = math.exp %176 : vector<1x32xf32>
    %cst_44 = arith.constant 1.000000e+00 : f32
    %178 = vector.broadcast %cst_44 : f32 to vector<1x32xf32>
    %179 = arith.addf %178, %177 : vector<1x32xf32>
    %180 = arith.divf %178, %179 : vector<1x32xf32>
    %181 = vector.extract_strided_slice %168 {offsets = [0, 64], sizes = [1, 32], strides = [1, 1]} : vector<1x128xf32> to vector<1x32xf32>
    %182 = vector.extract_strided_slice %168 {offsets = [0, 96], sizes = [1, 32], strides = [1, 1]} : vector<1x128xf32> to vector<1x32xf32>
    %183 = arith.mulf %174, %182 : vector<1x32xf32>
    %184 = arith.addf %181, %183 : vector<1x32xf32>
    %185 = math.tanh %184 : vector<1x32xf32>
    %cst_45 = arith.constant 1.000000e+00 : f32
    %186 = vector.broadcast %cst_45 : f32 to vector<1x32xf32>
    %187 = arith.subf %186, %180 : vector<1x32xf32>
    %188 = arith.mulf %187, %185 : vector<1x32xf32>
    %189 = arith.mulf %180, %164 : vector<1x32xf32>
    %190 = arith.addf %188, %189 : vector<1x32xf32>
    %c6 = arith.constant 6 : index
    %c0_46 = arith.constant 0 : index
    %191 = vector.load %arg10[%c6, %c0_46] : memref<8x32xf32, #tpu.memory_space<vmem>>, vector<1x32xf32>
    tpu.vector_store %arg10[%c6, %c0_46], %190 {strides = array<i32>} : memref<8x32xf32, #tpu.memory_space<vmem>>, vector<1x32xf32>,
    %192 = vector.extract_strided_slice %6 {offsets = [7, 0], sizes = [1, 128], strides = [1, 1]} : vector<8x128xf32> to vector<1x128xf32>
    %cst_47 = arith.constant dense<0.000000e+00> : vector<1x128xf32>
    %193 = tpu.matmul %190, %8, %cst_47 {dimension_numbers = #tpu.dot_dimension_numbers<[1], [0], [0], [1], [0, 0, 1, 1], [], []>} : vector<1x32xf32>, vector<32x128xf32>, vector<1x128xf32> -> vector<1x128xf32>
    %194 = arith.addf %192, %193 : vector<1x128xf32>
    %195 = vector.extract_strided_slice %194 {offsets = [0, 0], sizes = [1, 32], strides = [1, 1]} : vector<1x128xf32> to vector<1x32xf32>
    %196 = arith.negf %195 : vector<1x32xf32>
    %197 = math.exp %196 : vector<1x32xf32>
    %cst_48 = arith.constant 1.000000e+00 : f32
    %198 = vector.broadcast %cst_48 : f32 to vector<1x32xf32>
    %199 = arith.addf %198, %197 : vector<1x32xf32>
    %200 = arith.divf %198, %199 : vector<1x32xf32>
    %201 = vector.extract_strided_slice %194 {offsets = [0, 32], sizes = [1, 32], strides = [1, 1]} : vector<1x128xf32> to vector<1x32xf32>
    %202 = arith.negf %201 : vector<1x32xf32>
    %203 = math.exp %202 : vector<1x32xf32>
    %cst_49 = arith.constant 1.000000e+00 : f32
    %204 = vector.broadcast %cst_49 : f32 to vector<1x32xf32>
    %205 = arith.addf %204, %203 : vector<1x32xf32>
    %206 = arith.divf %204, %205 : vector<1x32xf32>
    %207 = vector.extract_strided_slice %194 {offsets = [0, 64], sizes = [1, 32], strides = [1, 1]} : vector<1x128xf32> to vector<1x32xf32>
    %208 = vector.extract_strided_slice %194 {offsets = [0, 96], sizes = [1, 32], strides = [1, 1]} : vector<1x128xf32> to vector<1x32xf32>
    %209 = arith.mulf %200, %208 : vector<1x32xf32>
    %210 = arith.addf %207, %209 : vector<1x32xf32>
    %211 = math.tanh %210 : vector<1x32xf32>
    %cst_50 = arith.constant 1.000000e+00 : f32
    %212 = vector.broadcast %cst_50 : f32 to vector<1x32xf32>
    %213 = arith.subf %212, %206 : vector<1x32xf32>
    %214 = arith.mulf %213, %211 : vector<1x32xf32>
    %215 = arith.mulf %206, %190 : vector<1x32xf32>
    %216 = arith.addf %214, %215 : vector<1x32xf32>
    %c7 = arith.constant 7 : index
    %c0_51 = arith.constant 0 : index
    %217 = vector.load %arg10[%c7, %c0_51] : memref<8x32xf32, #tpu.memory_space<vmem>>, vector<1x32xf32>
    tpu.vector_store %arg10[%c7, %c0_51], %216 {strides = array<i32>} : memref<8x32xf32, #tpu.memory_space<vmem>>, vector<1x32xf32>,
    %c0_52 = arith.constant 0 : index
    %c0_53 = arith.constant 0 : index
    %218 = vector.load %arg9[%c0_52, %c0_53] : memref<2x32xf32, #tpu.memory_space<vmem>>, vector<1x32xf32>
    tpu.vector_store %arg9[%c0_52, %c0_53], %216 {strides = array<i32>} : memref<2x32xf32, #tpu.memory_space<vmem>>, vector<1x32xf32>,
    %c0_54 = arith.constant 0 : index
    %c0_55 = arith.constant 0 : index
    %219 = vector.load %arg10[%c0_54, %c0_55] : memref<8x32xf32, #tpu.memory_space<vmem>>, vector<8x32xf32>
    %c1_56 = arith.constant 1 : index
    %c0_57 = arith.constant 0 : index
    %c0_58 = arith.constant 0 : index
    %220 = vector.load %arg3[%c1_56, %c0_57, %c0_58] : memref<2x32x128xf32, #tpu.memory_space<vmem>>, vector<1x32x128xf32>
    %221 = vector.shape_cast %220 : vector<1x32x128xf32> to vector<32x128xf32>
    %cst_59 = arith.constant dense<0.000000e+00> : vector<8x128xf32>
    %222 = tpu.matmul %219, %221, %cst_59 {dimension_numbers = #tpu.dot_dimension_numbers<[1], [0], [0], [1], [0, 0, 1, 1], [], []>} : vector<8x32xf32>, vector<32x128xf32>, vector<8x128xf32> -> vector<8x128xf32>
    %c1_60 = arith.constant 1 : index
    %c0_61 = arith.constant 0 : index
    %223 = vector.load %arg5[%c1_60, %c0_61] : memref<2x128xf32, #tpu.memory_space<vmem>>, vector<1x128xf32>
    %224 = vector.broadcast %223 : vector<1x128xf32> to vector<8x128xf32>
    %225 = arith.addf %222, %224 : vector<8x128xf32>
    %c1_62 = arith.constant 1 : index
    %c0_63 = arith.constant 0 : index
    %c0_64 = arith.constant 0 : index
    %226 = vector.load %arg4[%c1_62, %c0_63, %c0_64] : memref<2x32x128xf32, #tpu.memory_space<vmem>>, vector<1x32x128xf32>
    %227 = vector.shape_cast %226 : vector<1x32x128xf32> to vector<32x128xf32>
    %c1_65 = arith.constant 1 : index
    %c0_66 = arith.constant 0 : index
    %228 = vector.load %arg2[%c1_65, %c0_66] : memref<2x32xf32, #tpu.memory_space<vmem>>, vector<1x32xf32>
    %229 = vector.extract_strided_slice %225 {offsets = [0, 0], sizes = [1, 128], strides = [1, 1]} : vector<8x128xf32> to vector<1x128xf32>
    %cst_67 = arith.constant dense<0.000000e+00> : vector<1x128xf32>
    %230 = tpu.matmul %228, %227, %cst_67 {dimension_numbers = #tpu.dot_dimension_numbers<[1], [0], [0], [1], [0, 0, 1, 1], [], []>} : vector<1x32xf32>, vector<32x128xf32>, vector<1x128xf32> -> vector<1x128xf32>
    %231 = arith.addf %229, %230 : vector<1x128xf32>
    %232 = vector.extract_strided_slice %231 {offsets = [0, 0], sizes = [1, 32], strides = [1, 1]} : vector<1x128xf32> to vector<1x32xf32>
    %233 = arith.negf %232 : vector<1x32xf32>
    %234 = math.exp %233 : vector<1x32xf32>
    %cst_68 = arith.constant 1.000000e+00 : f32
    %235 = vector.broadcast %cst_68 : f32 to vector<1x32xf32>
    %236 = arith.addf %235, %234 : vector<1x32xf32>
    %237 = arith.divf %235, %236 : vector<1x32xf32>
    %238 = vector.extract_strided_slice %231 {offsets = [0, 32], sizes = [1, 32], strides = [1, 1]} : vector<1x128xf32> to vector<1x32xf32>
    %239 = arith.negf %238 : vector<1x32xf32>
    %240 = math.exp %239 : vector<1x32xf32>
    %cst_69 = arith.constant 1.000000e+00 : f32
    %241 = vector.broadcast %cst_69 : f32 to vector<1x32xf32>
    %242 = arith.addf %241, %240 : vector<1x32xf32>
    %243 = arith.divf %241, %242 : vector<1x32xf32>
    %244 = vector.extract_strided_slice %231 {offsets = [0, 64], sizes = [1, 32], strides = [1, 1]} : vector<1x128xf32> to vector<1x32xf32>
    %245 = vector.extract_strided_slice %231 {offsets = [0, 96], sizes = [1, 32], strides = [1, 1]} : vector<1x128xf32> to vector<1x32xf32>
    %246 = arith.mulf %237, %245 : vector<1x32xf32>
    %247 = arith.addf %244, %246 : vector<1x32xf32>
    %248 = math.tanh %247 : vector<1x32xf32>
    %cst_70 = arith.constant 1.000000e+00 : f32
    %249 = vector.broadcast %cst_70 : f32 to vector<1x32xf32>
    %250 = arith.subf %249, %243 : vector<1x32xf32>
    %251 = arith.mulf %250, %248 : vector<1x32xf32>
    %252 = arith.mulf %243, %228 : vector<1x32xf32>
    %253 = arith.addf %251, %252 : vector<1x32xf32>
    %c0_71 = arith.constant 0 : index
    %c0_72 = arith.constant 0 : index
    %254 = vector.load %arg10[%c0_71, %c0_72] : memref<8x32xf32, #tpu.memory_space<vmem>>, vector<1x32xf32>
    tpu.vector_store %arg10[%c0_71, %c0_72], %253 {strides = array<i32>} : memref<8x32xf32, #tpu.memory_space<vmem>>, vector<1x32xf32>,
    %255 = vector.extract_strided_slice %225 {offsets = [1, 0], sizes = [1, 128], strides = [1, 1]} : vector<8x128xf32> to vector<1x128xf32>
    %cst_73 = arith.constant dense<0.000000e+00> : vector<1x128xf32>
    %256 = tpu.matmul %253, %227, %cst_73 {dimension_numbers = #tpu.dot_dimension_numbers<[1], [0], [0], [1], [0, 0, 1, 1], [], []>} : vector<1x32xf32>, vector<32x128xf32>, vector<1x128xf32> -> vector<1x128xf32>
    %257 = arith.addf %255, %256 : vector<1x128xf32>
    %258 = vector.extract_strided_slice %257 {offsets = [0, 0], sizes = [1, 32], strides = [1, 1]} : vector<1x128xf32> to vector<1x32xf32>
    %259 = arith.negf %258 : vector<1x32xf32>
    %260 = math.exp %259 : vector<1x32xf32>
    %cst_74 = arith.constant 1.000000e+00 : f32
    %261 = vector.broadcast %cst_74 : f32 to vector<1x32xf32>
    %262 = arith.addf %261, %260 : vector<1x32xf32>
    %263 = arith.divf %261, %262 : vector<1x32xf32>
    %264 = vector.extract_strided_slice %257 {offsets = [0, 32], sizes = [1, 32], strides = [1, 1]} : vector<1x128xf32> to vector<1x32xf32>
    %265 = arith.negf %264 : vector<1x32xf32>
    %266 = math.exp %265 : vector<1x32xf32>
    %cst_75 = arith.constant 1.000000e+00 : f32
    %267 = vector.broadcast %cst_75 : f32 to vector<1x32xf32>
    %268 = arith.addf %267, %266 : vector<1x32xf32>
    %269 = arith.divf %267, %268 : vector<1x32xf32>
    %270 = vector.extract_strided_slice %257 {offsets = [0, 64], sizes = [1, 32], strides = [1, 1]} : vector<1x128xf32> to vector<1x32xf32>
    %271 = vector.extract_strided_slice %257 {offsets = [0, 96], sizes = [1, 32], strides = [1, 1]} : vector<1x128xf32> to vector<1x32xf32>
    %272 = arith.mulf %263, %271 : vector<1x32xf32>
    %273 = arith.addf %270, %272 : vector<1x32xf32>
    %274 = math.tanh %273 : vector<1x32xf32>
    %cst_76 = arith.constant 1.000000e+00 : f32
    %275 = vector.broadcast %cst_76 : f32 to vector<1x32xf32>
    %276 = arith.subf %275, %269 : vector<1x32xf32>
    %277 = arith.mulf %276, %274 : vector<1x32xf32>
    %278 = arith.mulf %269, %253 : vector<1x32xf32>
    %279 = arith.addf %277, %278 : vector<1x32xf32>
    %c1_77 = arith.constant 1 : index
    %c0_78 = arith.constant 0 : index
    %280 = vector.load %arg10[%c1_77, %c0_78] : memref<8x32xf32, #tpu.memory_space<vmem>>, vector<1x32xf32>
    tpu.vector_store %arg10[%c1_77, %c0_78], %279 {strides = array<i32>} : memref<8x32xf32, #tpu.memory_space<vmem>>, vector<1x32xf32>,
    %281 = vector.extract_strided_slice %225 {offsets = [2, 0], sizes = [1, 128], strides = [1, 1]} : vector<8x128xf32> to vector<1x128xf32>
    %cst_79 = arith.constant dense<0.000000e+00> : vector<1x128xf32>
    %282 = tpu.matmul %279, %227, %cst_79 {dimension_numbers = #tpu.dot_dimension_numbers<[1], [0], [0], [1], [0, 0, 1, 1], [], []>} : vector<1x32xf32>, vector<32x128xf32>, vector<1x128xf32> -> vector<1x128xf32>
    %283 = arith.addf %281, %282 : vector<1x128xf32>
    %284 = vector.extract_strided_slice %283 {offsets = [0, 0], sizes = [1, 32], strides = [1, 1]} : vector<1x128xf32> to vector<1x32xf32>
    %285 = arith.negf %284 : vector<1x32xf32>
    %286 = math.exp %285 : vector<1x32xf32>
    %cst_80 = arith.constant 1.000000e+00 : f32
    %287 = vector.broadcast %cst_80 : f32 to vector<1x32xf32>
    %288 = arith.addf %287, %286 : vector<1x32xf32>
    %289 = arith.divf %287, %288 : vector<1x32xf32>
    %290 = vector.extract_strided_slice %283 {offsets = [0, 32], sizes = [1, 32], strides = [1, 1]} : vector<1x128xf32> to vector<1x32xf32>
    %291 = arith.negf %290 : vector<1x32xf32>
    %292 = math.exp %291 : vector<1x32xf32>
    %cst_81 = arith.constant 1.000000e+00 : f32
    %293 = vector.broadcast %cst_81 : f32 to vector<1x32xf32>
    %294 = arith.addf %293, %292 : vector<1x32xf32>
    %295 = arith.divf %293, %294 : vector<1x32xf32>
    %296 = vector.extract_strided_slice %283 {offsets = [0, 64], sizes = [1, 32], strides = [1, 1]} : vector<1x128xf32> to vector<1x32xf32>
    %297 = vector.extract_strided_slice %283 {offsets = [0, 96], sizes = [1, 32], strides = [1, 1]} : vector<1x128xf32> to vector<1x32xf32>
    %298 = arith.mulf %289, %297 : vector<1x32xf32>
    %299 = arith.addf %296, %298 : vector<1x32xf32>
    %300 = math.tanh %299 : vector<1x32xf32>
    %cst_82 = arith.constant 1.000000e+00 : f32
    %301 = vector.broadcast %cst_82 : f32 to vector<1x32xf32>
    %302 = arith.subf %301, %295 : vector<1x32xf32>
    %303 = arith.mulf %302, %300 : vector<1x32xf32>
    %304 = arith.mulf %295, %279 : vector<1x32xf32>
    %305 = arith.addf %303, %304 : vector<1x32xf32>
    %c2_83 = arith.constant 2 : index
    %c0_84 = arith.constant 0 : index
    %306 = vector.load %arg10[%c2_83, %c0_84] : memref<8x32xf32, #tpu.memory_space<vmem>>, vector<1x32xf32>
    tpu.vector_store %arg10[%c2_83, %c0_84], %305 {strides = array<i32>} : memref<8x32xf32, #tpu.memory_space<vmem>>, vector<1x32xf32>,
    %307 = vector.extract_strided_slice %225 {offsets = [3, 0], sizes = [1, 128], strides = [1, 1]} : vector<8x128xf32> to vector<1x128xf32>
    %cst_85 = arith.constant dense<0.000000e+00> : vector<1x128xf32>
    %308 = tpu.matmul %305, %227, %cst_85 {dimension_numbers = #tpu.dot_dimension_numbers<[1], [0], [0], [1], [0, 0, 1, 1], [], []>} : vector<1x32xf32>, vector<32x128xf32>, vector<1x128xf32> -> vector<1x128xf32>
    %309 = arith.addf %307, %308 : vector<1x128xf32>
    %310 = vector.extract_strided_slice %309 {offsets = [0, 0], sizes = [1, 32], strides = [1, 1]} : vector<1x128xf32> to vector<1x32xf32>
    %311 = arith.negf %310 : vector<1x32xf32>
    %312 = math.exp %311 : vector<1x32xf32>
    %cst_86 = arith.constant 1.000000e+00 : f32
    %313 = vector.broadcast %cst_86 : f32 to vector<1x32xf32>
    %314 = arith.addf %313, %312 : vector<1x32xf32>
    %315 = arith.divf %313, %314 : vector<1x32xf32>
    %316 = vector.extract_strided_slice %309 {offsets = [0, 32], sizes = [1, 32], strides = [1, 1]} : vector<1x128xf32> to vector<1x32xf32>
    %317 = arith.negf %316 : vector<1x32xf32>
    %318 = math.exp %317 : vector<1x32xf32>
    %cst_87 = arith.constant 1.000000e+00 : f32
    %319 = vector.broadcast %cst_87 : f32 to vector<1x32xf32>
    %320 = arith.addf %319, %318 : vector<1x32xf32>
    %321 = arith.divf %319, %320 : vector<1x32xf32>
    %322 = vector.extract_strided_slice %309 {offsets = [0, 64], sizes = [1, 32], strides = [1, 1]} : vector<1x128xf32> to vector<1x32xf32>
    %323 = vector.extract_strided_slice %309 {offsets = [0, 96], sizes = [1, 32], strides = [1, 1]} : vector<1x128xf32> to vector<1x32xf32>
    %324 = arith.mulf %315, %323 : vector<1x32xf32>
    %325 = arith.addf %322, %324 : vector<1x32xf32>
    %326 = math.tanh %325 : vector<1x32xf32>
    %cst_88 = arith.constant 1.000000e+00 : f32
    %327 = vector.broadcast %cst_88 : f32 to vector<1x32xf32>
    %328 = arith.subf %327, %321 : vector<1x32xf32>
    %329 = arith.mulf %328, %326 : vector<1x32xf32>
    %330 = arith.mulf %321, %305 : vector<1x32xf32>
    %331 = arith.addf %329, %330 : vector<1x32xf32>
    %c3_89 = arith.constant 3 : index
    %c0_90 = arith.constant 0 : index
    %332 = vector.load %arg10[%c3_89, %c0_90] : memref<8x32xf32, #tpu.memory_space<vmem>>, vector<1x32xf32>
    tpu.vector_store %arg10[%c3_89, %c0_90], %331 {strides = array<i32>} : memref<8x32xf32, #tpu.memory_space<vmem>>, vector<1x32xf32>,
    %333 = vector.extract_strided_slice %225 {offsets = [4, 0], sizes = [1, 128], strides = [1, 1]} : vector<8x128xf32> to vector<1x128xf32>
    %cst_91 = arith.constant dense<0.000000e+00> : vector<1x128xf32>
    %334 = tpu.matmul %331, %227, %cst_91 {dimension_numbers = #tpu.dot_dimension_numbers<[1], [0], [0], [1], [0, 0, 1, 1], [], []>} : vector<1x32xf32>, vector<32x128xf32>, vector<1x128xf32> -> vector<1x128xf32>
    %335 = arith.addf %333, %334 : vector<1x128xf32>
    %336 = vector.extract_strided_slice %335 {offsets = [0, 0], sizes = [1, 32], strides = [1, 1]} : vector<1x128xf32> to vector<1x32xf32>
    %337 = arith.negf %336 : vector<1x32xf32>
    %338 = math.exp %337 : vector<1x32xf32>
    %cst_92 = arith.constant 1.000000e+00 : f32
    %339 = vector.broadcast %cst_92 : f32 to vector<1x32xf32>
    %340 = arith.addf %339, %338 : vector<1x32xf32>
    %341 = arith.divf %339, %340 : vector<1x32xf32>
    %342 = vector.extract_strided_slice %335 {offsets = [0, 32], sizes = [1, 32], strides = [1, 1]} : vector<1x128xf32> to vector<1x32xf32>
    %343 = arith.negf %342 : vector<1x32xf32>
    %344 = math.exp %343 : vector<1x32xf32>
    %cst_93 = arith.constant 1.000000e+00 : f32
    %345 = vector.broadcast %cst_93 : f32 to vector<1x32xf32>
    %346 = arith.addf %345, %344 : vector<1x32xf32>
    %347 = arith.divf %345, %346 : vector<1x32xf32>
    %348 = vector.extract_strided_slice %335 {offsets = [0, 64], sizes = [1, 32], strides = [1, 1]} : vector<1x128xf32> to vector<1x32xf32>
    %349 = vector.extract_strided_slice %335 {offsets = [0, 96], sizes = [1, 32], strides = [1, 1]} : vector<1x128xf32> to vector<1x32xf32>
    %350 = arith.mulf %341, %349 : vector<1x32xf32>
    %351 = arith.addf %348, %350 : vector<1x32xf32>
    %352 = math.tanh %351 : vector<1x32xf32>
    %cst_94 = arith.constant 1.000000e+00 : f32
    %353 = vector.broadcast %cst_94 : f32 to vector<1x32xf32>
    %354 = arith.subf %353, %347 : vector<1x32xf32>
    %355 = arith.mulf %354, %352 : vector<1x32xf32>
    %356 = arith.mulf %347, %331 : vector<1x32xf32>
    %357 = arith.addf %355, %356 : vector<1x32xf32>
    %c4_95 = arith.constant 4 : index
    %c0_96 = arith.constant 0 : index
    %358 = vector.load %arg10[%c4_95, %c0_96] : memref<8x32xf32, #tpu.memory_space<vmem>>, vector<1x32xf32>
    tpu.vector_store %arg10[%c4_95, %c0_96], %357 {strides = array<i32>} : memref<8x32xf32, #tpu.memory_space<vmem>>, vector<1x32xf32>,
    %359 = vector.extract_strided_slice %225 {offsets = [5, 0], sizes = [1, 128], strides = [1, 1]} : vector<8x128xf32> to vector<1x128xf32>
    %cst_97 = arith.constant dense<0.000000e+00> : vector<1x128xf32>
    %360 = tpu.matmul %357, %227, %cst_97 {dimension_numbers = #tpu.dot_dimension_numbers<[1], [0], [0], [1], [0, 0, 1, 1], [], []>} : vector<1x32xf32>, vector<32x128xf32>, vector<1x128xf32> -> vector<1x128xf32>
    %361 = arith.addf %359, %360 : vector<1x128xf32>
    %362 = vector.extract_strided_slice %361 {offsets = [0, 0], sizes = [1, 32], strides = [1, 1]} : vector<1x128xf32> to vector<1x32xf32>
    %363 = arith.negf %362 : vector<1x32xf32>
    %364 = math.exp %363 : vector<1x32xf32>
    %cst_98 = arith.constant 1.000000e+00 : f32
    %365 = vector.broadcast %cst_98 : f32 to vector<1x32xf32>
    %366 = arith.addf %365, %364 : vector<1x32xf32>
    %367 = arith.divf %365, %366 : vector<1x32xf32>
    %368 = vector.extract_strided_slice %361 {offsets = [0, 32], sizes = [1, 32], strides = [1, 1]} : vector<1x128xf32> to vector<1x32xf32>
    %369 = arith.negf %368 : vector<1x32xf32>
    %370 = math.exp %369 : vector<1x32xf32>
    %cst_99 = arith.constant 1.000000e+00 : f32
    %371 = vector.broadcast %cst_99 : f32 to vector<1x32xf32>
    %372 = arith.addf %371, %370 : vector<1x32xf32>
    %373 = arith.divf %371, %372 : vector<1x32xf32>
    %374 = vector.extract_strided_slice %361 {offsets = [0, 64], sizes = [1, 32], strides = [1, 1]} : vector<1x128xf32> to vector<1x32xf32>
    %375 = vector.extract_strided_slice %361 {offsets = [0, 96], sizes = [1, 32], strides = [1, 1]} : vector<1x128xf32> to vector<1x32xf32>
    %376 = arith.mulf %367, %375 : vector<1x32xf32>
    %377 = arith.addf %374, %376 : vector<1x32xf32>
    %378 = math.tanh %377 : vector<1x32xf32>
    %cst_100 = arith.constant 1.000000e+00 : f32
    %379 = vector.broadcast %cst_100 : f32 to vector<1x32xf32>
    %380 = arith.subf %379, %373 : vector<1x32xf32>
    %381 = arith.mulf %380, %378 : vector<1x32xf32>
    %382 = arith.mulf %373, %357 : vector<1x32xf32>
    %383 = arith.addf %381, %382 : vector<1x32xf32>
    %c5_101 = arith.constant 5 : index
    %c0_102 = arith.constant 0 : index
    %384 = vector.load %arg10[%c5_101, %c0_102] : memref<8x32xf32, #tpu.memory_space<vmem>>, vector<1x32xf32>
    tpu.vector_store %arg10[%c5_101, %c0_102], %383 {strides = array<i32>} : memref<8x32xf32, #tpu.memory_space<vmem>>, vector<1x32xf32>,
    %385 = vector.extract_strided_slice %225 {offsets = [6, 0], sizes = [1, 128], strides = [1, 1]} : vector<8x128xf32> to vector<1x128xf32>
    %cst_103 = arith.constant dense<0.000000e+00> : vector<1x128xf32>
    %386 = tpu.matmul %383, %227, %cst_103 {dimension_numbers = #tpu.dot_dimension_numbers<[1], [0], [0], [1], [0, 0, 1, 1], [], []>} : vector<1x32xf32>, vector<32x128xf32>, vector<1x128xf32> -> vector<1x128xf32>
    %387 = arith.addf %385, %386 : vector<1x128xf32>
    %388 = vector.extract_strided_slice %387 {offsets = [0, 0], sizes = [1, 32], strides = [1, 1]} : vector<1x128xf32> to vector<1x32xf32>
    %389 = arith.negf %388 : vector<1x32xf32>
    %390 = math.exp %389 : vector<1x32xf32>
    %cst_104 = arith.constant 1.000000e+00 : f32
    %391 = vector.broadcast %cst_104 : f32 to vector<1x32xf32>
    %392 = arith.addf %391, %390 : vector<1x32xf32>
    %393 = arith.divf %391, %392 : vector<1x32xf32>
    %394 = vector.extract_strided_slice %387 {offsets = [0, 32], sizes = [1, 32], strides = [1, 1]} : vector<1x128xf32> to vector<1x32xf32>
    %395 = arith.negf %394 : vector<1x32xf32>
    %396 = math.exp %395 : vector<1x32xf32>
    %cst_105 = arith.constant 1.000000e+00 : f32
    %397 = vector.broadcast %cst_105 : f32 to vector<1x32xf32>
    %398 = arith.addf %397, %396 : vector<1x32xf32>
    %399 = arith.divf %397, %398 : vector<1x32xf32>
    %400 = vector.extract_strided_slice %387 {offsets = [0, 64], sizes = [1, 32], strides = [1, 1]} : vector<1x128xf32> to vector<1x32xf32>
    %401 = vector.extract_strided_slice %387 {offsets = [0, 96], sizes = [1, 32], strides = [1, 1]} : vector<1x128xf32> to vector<1x32xf32>
    %402 = arith.mulf %393, %401 : vector<1x32xf32>
    %403 = arith.addf %400, %402 : vector<1x32xf32>
    %404 = math.tanh %403 : vector<1x32xf32>
    %cst_106 = arith.constant 1.000000e+00 : f32
    %405 = vector.broadcast %cst_106 : f32 to vector<1x32xf32>
    %406 = arith.subf %405, %399 : vector<1x32xf32>
    %407 = arith.mulf %406, %404 : vector<1x32xf32>
    %408 = arith.mulf %399, %383 : vector<1x32xf32>
    %409 = arith.addf %407, %408 : vector<1x32xf32>
    %c6_107 = arith.constant 6 : index
    %c0_108 = arith.constant 0 : index
    %410 = vector.load %arg10[%c6_107, %c0_108] : memref<8x32xf32, #tpu.memory_space<vmem>>, vector<1x32xf32>
    tpu.vector_store %arg10[%c6_107, %c0_108], %409 {strides = array<i32>} : memref<8x32xf32, #tpu.memory_space<vmem>>, vector<1x32xf32>,
    %411 = vector.extract_strided_slice %225 {offsets = [7, 0], sizes = [1, 128], strides = [1, 1]} : vector<8x128xf32> to vector<1x128xf32>
    %cst_109 = arith.constant dense<0.000000e+00> : vector<1x128xf32>
    %412 = tpu.matmul %409, %227, %cst_109 {dimension_numbers = #tpu.dot_dimension_numbers<[1], [0], [0], [1], [0, 0, 1, 1], [], []>} : vector<1x32xf32>, vector<32x128xf32>, vector<1x128xf32> -> vector<1x128xf32>
    %413 = arith.addf %411, %412 : vector<1x128xf32>
    %414 = vector.extract_strided_slice %413 {offsets = [0, 0], sizes = [1, 32], strides = [1, 1]} : vector<1x128xf32> to vector<1x32xf32>
    %415 = arith.negf %414 : vector<1x32xf32>
    %416 = math.exp %415 : vector<1x32xf32>
    %cst_110 = arith.constant 1.000000e+00 : f32
    %417 = vector.broadcast %cst_110 : f32 to vector<1x32xf32>
    %418 = arith.addf %417, %416 : vector<1x32xf32>
    %419 = arith.divf %417, %418 : vector<1x32xf32>
    %420 = vector.extract_strided_slice %413 {offsets = [0, 32], sizes = [1, 32], strides = [1, 1]} : vector<1x128xf32> to vector<1x32xf32>
    %421 = arith.negf %420 : vector<1x32xf32>
    %422 = math.exp %421 : vector<1x32xf32>
    %cst_111 = arith.constant 1.000000e+00 : f32
    %423 = vector.broadcast %cst_111 : f32 to vector<1x32xf32>
    %424 = arith.addf %423, %422 : vector<1x32xf32>
    %425 = arith.divf %423, %424 : vector<1x32xf32>
    %426 = vector.extract_strided_slice %413 {offsets = [0, 64], sizes = [1, 32], strides = [1, 1]} : vector<1x128xf32> to vector<1x32xf32>
    %427 = vector.extract_strided_slice %413 {offsets = [0, 96], sizes = [1, 32], strides = [1, 1]} : vector<1x128xf32> to vector<1x32xf32>
    %428 = arith.mulf %419, %427 : vector<1x32xf32>
    %429 = arith.addf %426, %428 : vector<1x32xf32>
    %430 = math.tanh %429 : vector<1x32xf32>
    %cst_112 = arith.constant 1.000000e+00 : f32
    %431 = vector.broadcast %cst_112 : f32 to vector<1x32xf32>
    %432 = arith.subf %431, %425 : vector<1x32xf32>
    %433 = arith.mulf %432, %430 : vector<1x32xf32>
    %434 = arith.mulf %425, %409 : vector<1x32xf32>
    %435 = arith.addf %433, %434 : vector<1x32xf32>
    %c7_113 = arith.constant 7 : index
    %c0_114 = arith.constant 0 : index
    %436 = vector.load %arg10[%c7_113, %c0_114] : memref<8x32xf32, #tpu.memory_space<vmem>>, vector<1x32xf32>
    tpu.vector_store %arg10[%c7_113, %c0_114], %435 {strides = array<i32>} : memref<8x32xf32, #tpu.memory_space<vmem>>, vector<1x32xf32>,
    %c1_115 = arith.constant 1 : index
    %c0_116 = arith.constant 0 : index
    %437 = vector.load %arg9[%c1_115, %c0_116] : memref<2x32xf32, #tpu.memory_space<vmem>>, vector<1x32xf32>
    tpu.vector_store %arg9[%c1_115, %c0_116], %435 {strides = array<i32>} : memref<2x32xf32, #tpu.memory_space<vmem>>, vector<1x32xf32>,
    %c0_117 = arith.constant 0 : index
    %c0_118 = arith.constant 0 : index
    %438 = vector.load %arg10[%c0_117, %c0_118] : memref<8x32xf32, #tpu.memory_space<vmem>>, vector<8x32xf32>
    %c0_119 = arith.constant 0 : index
    %c0_120 = arith.constant 0 : index
    %439 = vector.load %arg6[%c0_119, %c0_120] : memref<32x128xf32, #tpu.memory_space<vmem>>, vector<32x128xf32>
    %cst_121 = arith.constant dense<0.000000e+00> : vector<8x128xf32>
    %440 = tpu.matmul %438, %439, %cst_121 {dimension_numbers = #tpu.dot_dimension_numbers<[1], [0], [0], [1], [0, 0, 1, 1], [], []>} : vector<8x32xf32>, vector<32x128xf32>, vector<8x128xf32> -> vector<8x128xf32>
    %c0_122 = arith.constant 0 : index
    %c0_123 = arith.constant 0 : index
    %441 = vector.load %arg7[%c0_122, %c0_123] : memref<1x128xf32, #tpu.memory_space<vmem>>, vector<1x128xf32>
    %442 = vector.broadcast %441 : vector<1x128xf32> to vector<8x128xf32>
    %443 = arith.addf %440, %442 : vector<8x128xf32>
    %c0_124 = arith.constant 0 : index
    %c0_125 = arith.constant 0 : index
    %444 = vector.load %arg8[%c0_124, %c0_125] : memref<8x128xf32, #tpu.memory_space<vmem>>, vector<8x128xf32>
    tpu.vector_store %arg8[%c0_124, %c0_125], %443 {strides = array<i32>} : memref<8x128xf32, #tpu.memory_space<vmem>>, vector<8x128xf32>,
    return
  }
  func.func @transform_0(%arg0: i32) -> (i32, i32) {
    %c0_i32 = arith.constant 0 : i32
    %c0_i32_0 = arith.constant 0 : i32
    %c0_i32_1 = arith.constant 0 : i32
    return %c0_i32, %c0_i32_0 : i32, i32
  }
  func.func @transform_1(%arg0: i32) -> (i32, i32) {
    %c0_i32 = arith.constant 0 : i32
    %c0_i32_0 = arith.constant 0 : i32
    %c0_i32_1 = arith.constant 0 : i32
    return %c0_i32, %c0_i32_0 : i32, i32
  }
  func.func @transform_2(%arg0: i32) -> (i32, i32, i32) {
    %c0_i32 = arith.constant 0 : i32
    %c0_i32_0 = arith.constant 0 : i32
    %c0_i32_1 = arith.constant 0 : i32
    %c0_i32_2 = arith.constant 0 : i32
    return %c0_i32, %c0_i32_0, %c0_i32_1 : i32, i32, i32
  }
  func.func @transform_3(%arg0: i32) -> (i32, i32, i32) {
    %c0_i32 = arith.constant 0 : i32
    %c0_i32_0 = arith.constant 0 : i32
    %c0_i32_1 = arith.constant 0 : i32
    %c0_i32_2 = arith.constant 0 : i32
    return %c0_i32, %c0_i32_0, %c0_i32_1 : i32, i32, i32
  }
  func.func @transform_4(%arg0: i32) -> (i32, i32) {
    %c0_i32 = arith.constant 0 : i32
    %c0_i32_0 = arith.constant 0 : i32
    %c0_i32_1 = arith.constant 0 : i32
    return %c0_i32, %c0_i32_0 : i32, i32
  }
  func.func @transform_5(%arg0: i32) -> (i32, i32) {
    %c0_i32 = arith.constant 0 : i32
    %c0_i32_0 = arith.constant 0 : i32
    %c0_i32_1 = arith.constant 0 : i32
    return %c0_i32, %c0_i32_0 : i32, i32
  }
  func.func @transform_6(%arg0: i32) -> (i32, i32) {
    %c0_i32 = arith.constant 0 : i32
    %c0_i32_0 = arith.constant 0 : i32
    %c0_i32_1 = arith.constant 0 : i32
    return %c0_i32, %c0_i32_0 : i32, i32
  }
  func.func @transform_7(%arg0: i32) -> (i32, i32) {
    %c0_i32 = arith.constant 0 : i32
    %c0_i32_0 = arith.constant 0 : i32
    %c0_i32_1 = arith.constant 0 : i32
    return %c0_i32, %c0_i32_0 : i32, i32
  }
  func.func @transform_8(%arg0: i32) -> (i32, i32) {
    %c0_i32 = arith.constant 0 : i32
    %c0_i32_0 = arith.constant 0 : i32
    %c0_i32_1 = arith.constant 0 : i32
    return %c0_i32, %c0_i32_0 : i32, i32
  }
}

</mosaic_0001>

<bundles_post_ra>
// kernel: rnn_forward.1
= control target key start
LH: loop header
LB: loop body
LE: loop exit
PB: predicated region body
PF: predicated region fallthrough
CT: control target
= control target key end

     0   :  { %14 = vsyncpa [#allocation4], 0  ;;  %v2592_v2 = vmov 0.0   ;;  %s3102_s0 = inlined_call_operand.vmem [shape: f32[8,32], index: 0, kind: input, shape index: {}]   ;;  %s3103_s1 = inlined_call_operand.vmem [shape: f32[2,32], index: 1, kind: input, shape index: {}]   ;;  %s3104_s2 = inlined_call_operand.vmem [shape: f32[2,32,128], index: 2, kind: input, shape index: {}]   ;;  %s3105_s3 = inlined_call_operand.vmem [shape: f32[2,32,128], index: 3, kind: input, shape index: {}]   ;;  %s3106_s4 = inlined_call_operand.vmem [shape: f32[2,128], index: 4, kind: input, shape index: {}]   ;;  %s3107_s5 = inlined_call_operand.vmem [shape: f32[32,128], index: 5, kind: input, shape index: {}]   ;;  %s3108_s6 = inlined_call_operand.vmem [shape: f32[1,128], index: 6, kind: input, shape index: {}]   ;;  %s3109_s7 = inlined_call_operand.hbm [shape: f32[8,128], index: 7, kind: output, shape index: {0}]   ;;  %s3110_s8 = inlined_call_operand.hbm [shape: f32[2,32], index: 8, kind: output, shape index: {1}]  }
   0x1   :  { %v34_v0 = vld [vmem:[%s3104_s2 + $0x18] sm:$0xff]  ;;  %2236 = vmatprep.subr.mxu0 %v2592_v2  ;;  %2247 = vmatprep.subr.mxu1 %v2592_v2  ;;  %v33_v3 = vld [vmem:[%s3104_s2 + $0x10] sm:$0xff]  ;;  %v32_v5 = vld [vmem:[%s3104_s2 + $0x8] sm:$0xff] }
   0x2   :  { %v2650_v1 = vld [vmem:[%s3105_s3 + $0x18] sm:$0xff]  ;;  %v2660_v4 = vld [vmem:[%s3105_s3 + $0x10] sm:$0xff]  ;;  %2237 = vmatpush3.msra.mxu0 %v34_v0  ;;  %v2671_v6 = vld [vmem:[%s3105_s3 + $0x8] sm:$0xff] }
   0x3   :  { %2248 = vmatpush3.msra.mxu1 %v2650_v1  ;;  %2238 = vmatprep.subr.mxu0 %v2592_v2 }
   0x4   :  { %2249 = vmatprep.subr.mxu1 %v2592_v2 }
   0x5   :  { %15 = vsyncpa [#allocation6], 0  ;;  %2239 = vmatpush3.msra.mxu0 %v33_v3  ;;  %2250 = vmatpush3.msra.mxu1 %v2660_v4  ;;  %v31_v7 = vld [vmem:[%s3104_s2] sm:$0xff]  ;;  %vm40_vm0 = vcmask 261120   ;;  %vm2593_vm1 = vmmov 0   ;;  %s2594_s26 = smov 32  }
   0x6   :  { %2240 = vmatprep.subr.mxu0 %v2592_v2  ;;  %2251 = vmatprep.subr.mxu1 %v2592_v2  ;;  %v2683_v8 = vld [vmem:[%s3105_s3] sm:$0xff]  ;;  %s2595_s27 = smov 64   ;;  %s2596_s28 = smov 96   ;;  %vm225_vm2 = vcmask 253952   ;;  %vm334_vm3 = vcmask 254977   ;;  %vm558_vm4 = vcmask 257027  }
   0x7   :  { %2241 = vmatpush3.msra.mxu0 %v32_v5  ;;  %2252 = vmatpush3.msra.mxu1 %v2671_v6  ;;  %v30_v9 = vld [vmem:[%s3102_s0] sm:$0xff]  ;;  %vm782_vm5 = vcmask 259077   ;;  %vm446_vm6 = vcmask 256002   ;;  %vm670_vm7 = vcmask 258052   ;;  %vm894_vm8 = vcmask 260102  }
   0x8   :  { %2242 = vmatprep.subr.mxu0 %v2592_v2  ;;  %2253 = vmatprep.subr.mxu1 %v2592_v2  ;;  %v118_v10 = vld [vmem:[%s3103_s1] sm:$0x1]  ;;  %vm1006_vm9 = vcmask 261127  }
   0x9   :  { %2243 = vmatpush3.msra.mxu0 %v31_v7  ;;  %2244 = vmatprep.mubr.msk.f32.mxu0 %vm2593_vm1, %v2592_v2  ;;  %v2095_v11 = vld [vmem:[%s3106_s4] ss:$0 sm:$0xff] }
   0xa   :  { %2254 = vmatpush3.msra.mxu1 %v2683_v8  ;;  %2255 = vmatprep.mubr.msk.f32.mxu1 %vm2593_vm1, %v2592_v2 }
   0xb   :  { %2245 = vmatmul.mubr.msk.f32.vlgmr.msra.gmra.mxu0 %vm40_vm0, %v30_v9  ;;  %2256 = vmatmul.mubr.msk.f32.vlgmr.msra.gmra.mxu1 %vm40_vm0, %v118_v10 }
   0xc   :  { %2258 = vmatprep.subr.mxu0 %v2592_v2  ;;  %2266 = vmatprep.mubr.msk.f32.mxu0 %vm2593_vm1, %v2592_v2 }
   0xd   :  { %2259 = vmatpush3.msra.mxu0 %v2650_v1  ;;  %2269 = vmatprep.subr.mxu1 %v2592_v2 }
   0xe   :  { %2260 = vmatprep.subr.mxu0 %v2592_v2  ;;  %2270 = vmatpush3.msra.mxu1 %v2650_v1 }
   0xf   :  { %2261 = vmatpush3.msra.mxu0 %v2660_v4  ;;  %2271 = vmatprep.subr.mxu1 %v2592_v2 }
  0x10   :  { %2262 = vmatprep.subr.mxu0 %v2592_v2  ;;  %2272 = vmatpush3.msra.mxu1 %v2660_v4 }
  0x11   :  { %2263 = vmatpush3.msra.mxu0 %v2671_v6  ;;  %2273 = vmatprep.subr.mxu1 %v2592_v2 }
  0x12   :  { %2264 = vmatprep.subr.mxu0 %v2592_v2  ;;  %2274 = vmatpush3.msra.mxu1 %v2671_v6 }
  0x13   :  { %2265 = vmatpush3.msra.mxu0 %v2683_v8  ;;  %2275 = vmatprep.subr.mxu1 %v2592_v2 }
  0x14   :  { %2276 = vmatpush3.msra.mxu1 %v2683_v8  ;;  %2277 = vmatprep.mubr.msk.f32.mxu1 %vm2593_vm1, %v2592_v2 }
  0x15   :  { %2280 = vmatprep.subr.mxu0 %v2592_v2  ;;  %2291 = vmatprep.subr.mxu1 %v2592_v2 }
  0xcb   :  { %v110_v12 = vpop.f32.mrf.mxu0  ;;  %v188_v13 = vpop.f32.mrf.mxu1 }
  0xcc   :  { %v2725_v14 = vadd.f32 %v2095_v11, %v110_v12 }
  0xcd   :  { %v2246_v15 = vpop.f32.mrf.mxu0  ;;  %v2257_v16 = vpop.f32.mrf.mxu1 }
  0xce   :  { %v192_v17 = vadd.f32 %v188_v13, %v2725_v14 }
  0xd0   :  { %200 = vrot.lane.b32.xlu0 %v192_v17, %s2594_s26  ;;  %v2098_v18 = vmul.f32 -1.442695, %v192_v17 }
  0xd2   :  { %2452 = vpow2.f32 %v2098_v18 }
  0xdf   :  { %v2453_v19 = vpop.eup %2452 }
  0xe0   :  { %v196_v20 = vadd.f32 1.0, %v2453_v19 }
  0xe2   :  { %2454 = vrcp.f32 %v196_v20 }
  0xef   :  { %v2455_v21 = vpop.eup %2454 }
  0xf0   :  { %v210_v28 = vsub.f32 1.0, %v2455_v21 }
 0x142   :  { %v201_v22 = vpop.permute.xlu0 %200 }
 0x143   :  { %v203_v23 = vmul.f32 %v2455_v21, %v201_v22 }
 0x145   :  { %205 = vrot.lane.b32.xlu0 %v203_v23, %s2595_s27 }
 0x1b7   :  { %v206_v24 = vpop.permute.xlu0 %205 }
 0x1b8   :  { %v208_v25 = vadd.f32 %v206_v24, %v192_v17 }
 0x1ba   :  { %2456 = vtanh.f32 %v208_v25 }
 0x1c7   :  { %v2457_v26 = vpop.eup %2456 }
 0x1c8   :  { %212 = vrot.lane.b32.xlu1 %v2457_v26, %s2596_s28 }
 0x1cc   :  { %216 = vrot.lane.b32.xlu1 %v118_v10, %s2594_s26 }
 0x23a   :  { %v213_v27 = vpop.permute.xlu1 %212 }
 0x23b   :  { %v215_v30 = vmul.f32 %v213_v27, %v210_v28 }
 0x23e   :  { %v217_v29 = vpop.permute.xlu1 %216 }
 0x23f   :  { %v219_v31 = vmul.f32 %v2455_v21, %v217_v29 }
 0x241   :  { %v220_v32 = vadd.f32 %v219_v31, %v215_v30 }
 0x243   :  { %222 = vrot.lane.b32.xlu0 %v220_v32, %s2596_s28  ;;  %v326_v47 = vrot.slane %v220_v32, 7 }
 0x2b5   :  { %v223_v33 = vpop.permute.xlu0 %222 }
 0x2b6   :  { %226 = vst.msk [vmem:[#allocation2] sm:$0x1] %vm225_vm2, %v223_v33  ;;  %2267 = vmatmul.mubr.msk.f32.vlgmr.msra.gmra.mxu0 %vm40_vm0, %v223_v33 }
 0x2b7   :  { %2281 = vmatpush3.msra.mxu0 %v2650_v1  ;;  %2288 = vmatprep.mubr.msk.f32.mxu0 %vm2593_vm1, %v2592_v2 }
 0x2b8   :  { %2282 = vmatprep.subr.mxu0 %v2592_v2 }
 0x2b9   :  { %2283 = vmatpush3.msra.mxu0 %v2660_v4 }
 0x2ba   :  { %2284 = vmatprep.subr.mxu0 %v2592_v2 }
 0x2bb   :  { %2285 = vmatpush3.msra.mxu0 %v2671_v6 }
 0x2bc   :  { %2286 = vmatprep.subr.mxu0 %v2592_v2 }
 0x2bd   :  { %2287 = vmatpush3.msra.mxu0 %v2683_v8 }
 0x2be   :  { %2302 = vmatprep.subr.mxu0 %v2592_v2 }
 0x376   :  { %v295_v34 = vpop.f32.mrf.mxu0 }
 0x377   :  { %v300_v35 = vrot.slane %v295_v34, 7 }
 0x378   :  { %v2268_v36 = vpop.f32.mrf.mxu0 }
 0x379   :  { %v302_v37 = vadd.f32 %v300_v35, %v2725_v14 }
 0x37b   :  { %310 = vrot.lane.b32.xlu1 %v302_v37, %s2594_s26  ;;  %v2100_v38 = vmul.f32 -1.442695, %v302_v37 }
 0x37d   :  { %2458 = vpow2.f32 %v2100_v38 }
 0x38a   :  { %v2459_v39 = vpop.eup %2458 }
 0x38b   :  { %v306_v40 = vadd.f32 1.0, %v2459_v39 }
 0x38d   :  { %2460 = vrcp.f32 %v306_v40 }
 0x39a   :  { %v2461_v41 = vpop.eup %2460 }
 0x39b   :  { %v320_v48 = vsub.f32 1.0, %v2461_v41  ;;  %v328_v50 = vmul.f32 %v2461_v41, %v326_v47 }
 0x3ed   :  { %v311_v42 = vpop.permute.xlu1 %310 }
 0x3ee   :  { %v313_v43 = vmul.f32 %v2461_v41, %v311_v42 }
 0x3f0   :  { %315 = vrot.lane.b32.xlu0 %v313_v43, %s2595_s27 }
 0x462   :  { %v316_v44 = vpop.permute.xlu0 %315 }
 0x463   :  { %v318_v45 = vadd.f32 %v316_v44, %v302_v37 }
 0x465   :  { %2462 = vtanh.f32 %v318_v45 }
 0x472   :  { %v2463_v46 = vpop.eup %2462 }
 0x473   :  { %322 = vrot.lane.b32.xlu1 %v2463_v46, %s2596_s28 }
 0x4e5   :  { %v323_v49 = vpop.permute.xlu1 %322 }
 0x4e6   :  { %v325_v51 = vmul.f32 %v323_v49, %v320_v48 }
 0x4e8   :  { %v2749_v52 = vadd.f32 %v328_v50, %v325_v51 }
 0x4ea   :  { %v336_v53 = vrot.slane %v2749_v52, 1  ;;  %v438_v10 = vrot.slane %v2749_v52, 7 }
 0x4ec   :  { %337 = vrot.lane.b32.xlu0 %v336_v53, %s2596_s28 }
 0x55e   :  { %v338_v54 = vpop.permute.xlu0 %337 }
 0x55f   :  { %2278 = vmatmul.mubr.msk.f32.vlgmr.msra.gmra.mxu1 %vm40_vm0, %v338_v54 }
 0x560   :  { %2292 = vmatpush3.msra.mxu1 %v2650_v1  ;;  %2299 = vmatprep.mubr.msk.f32.mxu1 %vm2593_vm1, %v2592_v2 }
 0x561   :  { %2293 = vmatprep.subr.mxu1 %v2592_v2 }
 0x562   :  { %2294 = vmatpush3.msra.mxu1 %v2660_v4 }
 0x563   :  { %2295 = vmatprep.subr.mxu1 %v2592_v2 }
 0x564   :  { %2296 = vmatpush3.msra.mxu1 %v2671_v6 }
 0x565   :  { %2297 = vmatprep.subr.mxu1 %v2592_v2 }
 0x566   :  { %2298 = vmatpush3.msra.mxu1 %v2683_v8 }
 0x567   :  { %2313 = vmatprep.subr.mxu1 %v2592_v2 }
 0x61f   :  { %v407_v55 = vpop.f32.mrf.mxu1 }
 0x620   :  { %v412_v56 = vrot.slane %v407_v55, 6 }
 0x621   :  { %v2279_v57 = vpop.f32.mrf.mxu1 }
 0x622   :  { %v414_v58 = vadd.f32 %v412_v56, %v2725_v14 }
 0x624   :  { %422 = vrot.lane.b32.xlu1 %v414_v58, %s2594_s26  ;;  %v2102_v59 = vmul.f32 -1.442695, %v414_v58 }
 0x626   :  { %2464 = vpow2.f32 %v2102_v59 }
 0x633   :  { %v2465_v60 = vpop.eup %2464 }
 0x634   :  { %v418_v61 = vadd.f32 1.0, %v2465_v60 }
 0x636   :  { %2466 = vrcp.f32 %v418_v61 }
 0x643   :  { %v2467_v62 = vpop.eup %2466 }
 0x644   :  { %v432_v9 = vsub.f32 1.0, %v2467_v62  ;;  %v440_v12 = vmul.f32 %v2467_v62, %v438_v10 }
 0x696   :  { %v423_v63 = vpop.permute.xlu1 %422 }
 0x697   :  { %v425_v0 = vmul.f32 %v2467_v62, %v423_v63 }
 0x699   :  { %427 = vrot.lane.b32.xlu0 %v425_v0, %s2595_s27 }
 0x70b   :  { %v428_v3 = vpop.permute.xlu0 %427 }
 0x70c   :  { %v430_v5 = vadd.f32 %v428_v3, %v414_v58 }
 0x70e   :  { %2468 = vtanh.f32 %v430_v5 }
 0x71b   :  { %v2469_v7 = vpop.eup %2468 }
 0x71c   :  { %434 = vrot.lane.b32.xlu1 %v2469_v7, %s2596_s28 }
 0x78e   :  { %v435_v11 = vpop.permute.xlu1 %434 }
 0x78f   :  { %v437_v13 = vmul.f32 %v435_v11, %v432_v9 }
 0x791   :  { %v2769_v15 = vadd.f32 %v440_v12, %v437_v13 }
 0x793   :  { %v448_v16 = vrot.slane %v2769_v15, 2  ;;  %v550_v32 = vrot.slane %v2769_v15, 7 }
 0x795   :  { %449 = vrot.lane.b32.xlu0 %v448_v16, %s2596_s28 }
 0x807   :  { %v450_v17 = vpop.permute.xlu0 %449 }
 0x808   :  { %2289 = vmatmul.mubr.msk.f32.vlgmr.msra.gmra.mxu0 %vm40_vm0, %v450_v17 }
 0x809   :  { %2303 = vmatpush3.msra.mxu0 %v2650_v1  ;;  %2310 = vmatprep.mubr.msk.f32.mxu0 %vm2593_vm1, %v2592_v2 }
 0x80a   :  { %2304 = vmatprep.subr.mxu0 %v2592_v2 }
 0x80b   :  { %2305 = vmatpush3.msra.mxu0 %v2660_v4 }
 0x80c   :  { %2306 = vmatprep.subr.mxu0 %v2592_v2 }
 0x80d   :  { %2307 = vmatpush3.msra.mxu0 %v2671_v6 }
 0x80e   :  { %2308 = vmatprep.subr.mxu0 %v2592_v2 }
 0x80f   :  { %2309 = vmatpush3.msra.mxu0 %v2683_v8 }
 0x810   :  { %2324 = vmatprep.subr.mxu0 %v2592_v2 }
 0x8c8   :  { %v519_v18 = vpop.f32.mrf.mxu0 }
 0x8c9   :  { %v524_v19 = vrot.slane %v519_v18, 5 }
 0x8ca   :  { %v2290_v20 = vpop.f32.mrf.mxu0 }
 0x8cb   :  { %v526_v21 = vadd.f32 %v524_v19, %v2725_v14 }
 0x8cd   :  { %534 = vrot.lane.b32.xlu1 %v526_v21, %s2594_s26  ;;  %v2104_v22 = vmul.f32 -1.442695, %v526_v21 }
 0x8cf   :  { %2470 = vpow2.f32 %v2104_v22 }
 0x8dc   :  { %v2471_v23 = vpop.eup %2470 }
 0x8dd   :  { %v530_v24 = vadd.f32 1.0, %v2471_v23 }
 0x8df   :  { %2472 = vrcp.f32 %v530_v24 }
 0x8ec   :  { %v2473_v25 = vpop.eup %2472 }
 0x8ed   :  { %v544_v31 = vsub.f32 1.0, %v2473_v25  ;;  %v552_v34 = vmul.f32 %v2473_v25, %v550_v32 }
 0x93f   :  { %v535_v26 = vpop.permute.xlu1 %534 }
 0x940   :  { %v537_v27 = vmul.f32 %v2473_v25, %v535_v26 }
 0x942   :  { %539 = vrot.lane.b32.xlu0 %v537_v27, %s2595_s27 }
 0x9b4   :  { %v540_v28 = vpop.permute.xlu0 %539 }
 0x9b5   :  { %v542_v29 = vadd.f32 %v540_v28, %v526_v21 }
 0x9b7   :  { %2474 = vtanh.f32 %v542_v29 }
 0x9c4   :  { %v2475_v30 = vpop.eup %2474 }
 0x9c5   :  { %546 = vrot.lane.b32.xlu1 %v2475_v30, %s2596_s28 }
 0xa37   :  { %v547_v33 = vpop.permute.xlu1 %546 }
 0xa38   :  { %v549_v35 = vmul.f32 %v547_v33, %v544_v31 }
 0xa3a   :  { %v2789_v36 = vadd.f32 %v552_v34, %v549_v35 }
 0xa3c   :  { %v560_v37 = vrot.slane %v2789_v36, 3  ;;  %v662_v54 = vrot.slane %v2789_v36, 7 }
 0xa3e   :  { %561 = vrot.lane.b32.xlu0 %v560_v37, %s2596_s28 }
 0xab0   :  { %v562_v38 = vpop.permute.xlu0 %561 }
 0xab1   :  { %2300 = vmatmul.mubr.msk.f32.vlgmr.msra.gmra.mxu1 %vm40_vm0, %v562_v38 }
 0xab2   :  { %2314 = vmatpush3.msra.mxu1 %v2650_v1  ;;  %2321 = vmatprep.mubr.msk.f32.mxu1 %vm2593_vm1, %v2592_v2 }
 0xab3   :  { %2315 = vmatprep.subr.mxu1 %v2592_v2 }
 0xab4   :  { %2316 = vmatpush3.msra.mxu1 %v2660_v4 }
 0xab5   :  { %2317 = vmatprep.subr.mxu1 %v2592_v2 }
 0xab6   :  { %2318 = vmatpush3.msra.mxu1 %v2671_v6 }
 0xab7   :  { %2319 = vmatprep.subr.mxu1 %v2592_v2 }
 0xab8   :  { %2320 = vmatpush3.msra.mxu1 %v2683_v8 }
 0xab9   :  { %2335 = vmatprep.subr.mxu1 %v2592_v2 }
 0xb71   :  { %v631_v39 = vpop.f32.mrf.mxu1 }
 0xb72   :  { %v636_v40 = vrot.slane %v631_v39, 4 }
 0xb73   :  { %v2301_v41 = vpop.f32.mrf.mxu1 }
 0xb74   :  { %v638_v42 = vadd.f32 %v636_v40, %v2725_v14 }
 0xb76   :  { %646 = vrot.lane.b32.xlu1 %v638_v42, %s2594_s26  ;;  %v2106_v43 = vmul.f32 -1.442695, %v638_v42 }
 0xb78   :  { %2476 = vpow2.f32 %v2106_v43 }
 0xb85   :  { %v2477_v44 = vpop.eup %2476 }
 0xb86   :  { %v642_v45 = vadd.f32 1.0, %v2477_v44 }
 0xb88   :  { %2478 = vrcp.f32 %v642_v45 }
 0xb95   :  { %v2479_v46 = vpop.eup %2478 }
 0xb96   :  { %v656_v53 = vsub.f32 1.0, %v2479_v46  ;;  %v664_v56 = vmul.f32 %v2479_v46, %v662_v54 }
 0xbe8   :  { %v647_v47 = vpop.permute.xlu1 %646 }
 0xbe9   :  { %v649_v48 = vmul.f32 %v2479_v46, %v647_v47 }
 0xbeb   :  { %651 = vrot.lane.b32.xlu0 %v649_v48, %s2595_s27 }
 0xc5d   :  { %v652_v49 = vpop.permute.xlu0 %651 }
 0xc5e   :  { %v654_v50 = vadd.f32 %v652_v49, %v638_v42 }
 0xc60   :  { %2480 = vtanh.f32 %v654_v50 }
 0xc6d   :  { %v2481_v51 = vpop.eup %2480 }
 0xc6e   :  { %658 = vrot.lane.b32.xlu1 %v2481_v51, %s2596_s28 }
 0xce0   :  { %v659_v55 = vpop.permute.xlu1 %658 }
 0xce1   :  { %v661_v57 = vmul.f32 %v659_v55, %v656_v53 }
 0xce3   :  { %v2809_v58 = vadd.f32 %v664_v56, %v661_v57 }
 0xce5   :  { %v672_v59 = vrot.slane %v2809_v58, 4  ;;  %v774_v12 = vrot.slane %v2809_v58, 7 }
 0xce7   :  { %673 = vrot.lane.b32.xlu0 %v672_v59, %s2596_s28  ;;  %v2868_v59 = vld [vmem:[%s3105_s3 + $0x38] sm:$0xff] }
 0xd59   :  { %v674_v60 = vpop.permute.xlu0 %673 }
 0xd5a   :  { %2311 = vmatmul.mubr.msk.f32.vlgmr.msra.gmra.mxu0 %vm40_vm0, %v674_v60  ;;  %v2115_v60 = vld [vmem:[%s3104_s2 + $0x30] sm:$0xff] }
 0xd5b   :  { %2325 = vmatpush3.msra.mxu0 %v2650_v1  ;;  %2332 = vmatprep.mubr.msk.f32.mxu0 %vm2593_vm1, %v2592_v2 }
 0xd5c   :  { %2326 = vmatprep.subr.mxu0 %v2592_v2 }
 0xd5d   :  { %2327 = vmatpush3.msra.mxu0 %v2660_v4 }
 0xd5e   :  { %2328 = vmatprep.subr.mxu0 %v2592_v2 }
 0xd5f   :  { %2329 = vmatpush3.msra.mxu0 %v2671_v6 }
 0xd60   :  { %2330 = vmatprep.subr.mxu0 %v2592_v2 }
 0xd61   :  { %2331 = vmatpush3.msra.mxu0 %v2683_v8 }
 0xd62   :  { %2346 = vmatprep.subr.mxu0 %v2592_v2 }
 0xe1a   :  { %v743_v61 = vpop.f32.mrf.mxu0 }
 0xe1b   :  { %v748_v62 = vrot.slane %v743_v61, 3  ;;  %v2887_v61 = vld [vmem:[%s3105_s3 + $0x28] sm:$0xff] }
 0xe1c   :  { %v2312_v1 = vpop.f32.mrf.mxu0 }
 0xe1d   :  { %v750_v63 = vadd.f32 %v748_v62, %v2725_v14  ;;  %v2113_v62 = vld [vmem:[%s3104_s2 + $0x20] sm:$0xff] }
 0xe1e   :  { %v2898_v1 = vld [vmem:[%s3105_s3 + $0x20] sm:$0xff] }
 0xe1f   :  { %758 = vrot.lane.b32.xlu1 %v750_v63, %s2594_s26  ;;  %v2108_v0 = vmul.f32 -1.442695, %v750_v63 }
 0xe21   :  { %2482 = vpow2.f32 %v2108_v0 }
 0xe2e   :  { %v2483_v4 = vpop.eup %2482 }
 0xe2f   :  { %v754_v3 = vadd.f32 1.0, %v2483_v4  ;;  %v1098_v4 = vld [vmem:[%s3103_s1 + $0x1] sm:$0x1] }
 0xe31   :  { %2484 = vrcp.f32 %v754_v3 }
 0xe3e   :  { %v2485_v5 = vpop.eup %2484 }
 0xe3f   :  { %v768_v11 = vsub.f32 1.0, %v2485_v5  ;;  %v776_v16 = vmul.f32 %v2485_v5, %v774_v12 }
 0xe91   :  { %v759_v6 = vpop.permute.xlu1 %758 }
 0xe92   :  { %v761_v7 = vmul.f32 %v2485_v5, %v759_v6 }
 0xe94   :  { %763 = vrot.lane.b32.xlu0 %v761_v7, %s2595_s27 }
 0xf06   :  { %v764_v8 = vpop.permute.xlu0 %763 }
 0xf07   :  { %v766_v9 = vadd.f32 %v764_v8, %v750_v63 }
 0xf09   :  { %2486 = vtanh.f32 %v766_v9 }
 0xf16   :  { %v2487_v10 = vpop.eup %2486 }
 0xf17   :  { %770 = vrot.lane.b32.xlu1 %v2487_v10, %s2596_s28 }
 0xf89   :  { %v771_v13 = vpop.permute.xlu1 %770 }
 0xf8a   :  { %v773_v17 = vmul.f32 %v771_v13, %v768_v11 }
 0xf8c   :  { %v777_v18 = vadd.f32 %v776_v16, %v773_v17  ;;  %v2117_v17 = vld [vmem:[%s3106_s4 + $0x1] ss:$0 sm:$0xff] }
 0xf8e   :  { %v784_v19 = vrot.slane %v777_v18, 5  ;;  %v886_v35 = vrot.slane %v777_v18, 7 }
 0xf90   :  { %785 = vrot.lane.b32.xlu0 %v784_v19, %s2596_s28 }
0x1002   :  { %v786_v20 = vpop.permute.xlu0 %785 }
0x1003   :  { %2322 = vmatmul.mubr.msk.f32.vlgmr.msra.gmra.mxu1 %vm40_vm0, %v786_v20 }
0x1004   :  { %2343 = vmatprep.mubr.msk.f32.mxu1 %vm2593_vm1, %v2592_v2 }
0x10c3   :  { %v855_v21 = vpop.f32.mrf.mxu1 }
0x10c4   :  { %v860_v22 = vrot.slane %v855_v21, 2 }
0x10c5   :  { %v2323_v23 = vpop.f32.mrf.mxu1 }
0x10c6   :  { %v862_v24 = vadd.f32 %v860_v22, %v2725_v14 }
0x10c8   :  { %870 = vrot.lane.b32.xlu1 %v862_v24, %s2594_s26  ;;  %v2110_v25 = vmul.f32 -1.442695, %v862_v24 }
0x10ca   :  { %2488 = vpow2.f32 %v2110_v25 }
0x10d7   :  { %v2489_v26 = vpop.eup %2488 }
0x10d8   :  { %v866_v27 = vadd.f32 1.0, %v2489_v26 }
0x10da   :  { %2490 = vrcp.f32 %v866_v27 }
0x10e7   :  { %v2491_v28 = vpop.eup %2490 }
0x10e8   :  { %v880_v34 = vsub.f32 1.0, %v2491_v28  ;;  %v888_v38 = vmul.f32 %v2491_v28, %v886_v35 }
0x113a   :  { %v871_v29 = vpop.permute.xlu1 %870 }
0x113b   :  { %v873_v30 = vmul.f32 %v2491_v28, %v871_v29 }
0x113d   :  { %875 = vrot.lane.b32.xlu0 %v873_v30, %s2595_s27 }
0x11af   :  { %v876_v31 = vpop.permute.xlu0 %875 }
0x11b0   :  { %v878_v32 = vadd.f32 %v876_v31, %v862_v24 }
0x11b2   :  { %2492 = vtanh.f32 %v878_v32 }
0x11bf   :  { %v2493_v33 = vpop.eup %2492 }
0x11c0   :  { %882 = vrot.lane.b32.xlu1 %v2493_v33, %s2596_s28 }
0x1232   :  { %v883_v37 = vpop.permute.xlu1 %882 }
0x1233   :  { %v885_v39 = vmul.f32 %v883_v37, %v880_v34 }
0x1235   :  { %v2837_v40 = vadd.f32 %v888_v38, %v885_v39 }
0x1237   :  { %v896_v41 = vrot.slane %v2837_v40, 6  ;;  %v998_v0 = vrot.slane %v2837_v40, 7 }
0x1239   :  { %897 = vrot.lane.b32.xlu0 %v896_v41, %s2596_s28 }
0x12ab   :  { %v898_v42 = vpop.permute.xlu0 %897 }
0x12ac   :  { %2333 = vmatmul.mubr.msk.f32.vlgmr.msra.gmra.mxu0 %vm40_vm0, %v898_v42 }
0x12ad   :  { %2354 = vmatprep.mubr.msk.f32.mxu0 %vm2593_vm1, %v2592_v2  ;;  %2347 = vmatpush3.msra.mxu0 %v2868_v59 }
0x12ae   :  { %2348 = vmatprep.subr.mxu0 %v2592_v2 }
0x136c   :  { %v967_v43 = vpop.f32.mrf.mxu0 }
0x136d   :  { %v972_v44 = vrot.slane %v967_v43, 1 }
0x136e   :  { %v2334_v45 = vpop.f32.mrf.mxu0 }
0x136f   :  { %v974_v46 = vadd.f32 %v972_v44, %v2725_v14 }
0x1371   :  { %982 = vrot.lane.b32.xlu1 %v974_v46, %s2594_s26  ;;  %v2112_v47 = vmul.f32 -1.442695, %v974_v46 }
0x1373   :  { %2494 = vpow2.f32 %v2112_v47 }
0x1380   :  { %v2495_v48 = vpop.eup %2494 }
0x1381   :  { %v978_v49 = vadd.f32 1.0, %v2495_v48 }
0x1383   :  { %2496 = vrcp.f32 %v978_v49 }
0x1390   :  { %v2497_v50 = vpop.eup %2496 }
0x1391   :  { %v992_v63 = vsub.f32 1.0, %v2497_v50  ;;  %v1000_v5 = vmul.f32 %v2497_v50, %v998_v0 }
0x13e3   :  { %v983_v51 = vpop.permute.xlu1 %982 }
0x13e4   :  { %v985_v53 = vmul.f32 %v2497_v50, %v983_v51 }
0x13e6   :  { %987 = vrot.lane.b32.xlu0 %v985_v53, %s2595_s27 }
0x13ea   :  { %331 = vrot.lane.b32.xlu0 %v2749_v52, %s2596_s28 }
0x13ee   :  { %555 = vrot.lane.b32.xlu0 %v2789_v36, %s2596_s28  ;;  %v2116_v36 = vld [vmem:[%s3104_s2 + $0x38] sm:$0xff] }
0x13ef   :  { %2336 = vmatpush3.msra.mxu1 %v2116_v36 }
0x13f0   :  { %2337 = vmatprep.subr.mxu1 %v2592_v2 }
0x13f1   :  { %2338 = vmatpush3.msra.mxu1 %v2115_v60 }
0x13f2   :  { %779 = vrot.lane.b32.xlu0 %v777_v18, %s2596_s28  ;;  %2339 = vmatprep.subr.mxu1 %v2592_v2 }
0x1458   :  { %v988_v14 = vpop.permute.xlu0 %987 }
0x1459   :  { %v990_v54 = vadd.f32 %v988_v14, %v974_v46 }
0x145b   :  { %2498 = vtanh.f32 %v990_v54 }
0x145c   :  { %v332_v55 = vpop.permute.xlu0 %331 }
0x145d   :  { %335 = vst.msk [vmem:[#allocation2] sm:$0x2] %vm334_vm3, %v332_v55 }
0x1460   :  { %v556_v56 = vpop.permute.xlu0 %555 }
0x1461   :  { %559 = vst.msk [vmem:[#allocation2] sm:$0x8] %vm558_vm4, %v556_v56 }
0x1464   :  { %v780_v57 = vpop.permute.xlu0 %779 }
0x1465   :  { %783 = vst.msk [vmem:[#allocation2] sm:$0x20] %vm782_vm5, %v780_v57 }
0x1468   :  { %v2499_v52 = vpop.eup %2498 }
0x1469   :  { %994 = vrot.lane.b32.xlu1 %v2499_v52, %s2596_s28 }
0x146d   :  { %443 = vrot.lane.b32.xlu1 %v2769_v15, %s2596_s28  ;;  %v2877_v15 = vld [vmem:[%s3105_s3 + $0x30] sm:$0xff] }
0x146e   :  { %2349 = vmatpush3.msra.mxu0 %v2877_v15 }
0x146f   :  { %2350 = vmatprep.subr.mxu0 %v2592_v2 }
0x1470   :  { %2351 = vmatpush3.msra.mxu0 %v2887_v61 }
0x1471   :  { %667 = vrot.lane.b32.xlu1 %v2809_v58, %s2596_s28  ;;  %v2114_v58 = vld [vmem:[%s3104_s2 + $0x28] sm:$0xff]  ;;  %2352 = vmatprep.subr.mxu0 %v2592_v2 }
0x1472   :  { %2340 = vmatpush3.msra.mxu1 %v2114_v58  ;;  %2353 = vmatpush3.msra.mxu0 %v2898_v1 }
0x1473   :  { %2341 = vmatprep.subr.mxu1 %v2592_v2  ;;  %2355 = vmatmul.mubr.msk.f32.vlgmr.msra.gmra.mxu0 %vm40_vm0, %v1098_v4 }
0x1474   :  { %2342 = vmatpush3.msra.mxu1 %v2113_v62  ;;  %2368 = vmatprep.subr.mxu0 %v2592_v2 }
0x1475   :  { %891 = vrot.lane.b32.xlu1 %v2837_v40, %s2596_s28  ;;  %2357 = vmatprep.subr.mxu1 %v2592_v2 }
0x1476   :  { %2376 = vmatprep.mubr.msk.f32.mxu0 %vm2593_vm1, %v2592_v2  ;;  %2369 = vmatpush3.msra.mxu0 %v2868_v59 }
0x1477   :  { %2370 = vmatprep.subr.mxu0 %v2592_v2 }
0x1478   :  { %2371 = vmatpush3.msra.mxu0 %v2877_v15 }
0x1479   :  { %2372 = vmatprep.subr.mxu0 %v2592_v2 }
0x147a   :  { %2373 = vmatpush3.msra.mxu0 %v2887_v61 }
0x147b   :  { %2374 = vmatprep.subr.mxu0 %v2592_v2 }
0x147c   :  { %2375 = vmatpush3.msra.mxu0 %v2898_v1 }
0x147d   :  { %2390 = vmatprep.subr.mxu0 %v2592_v2 }
0x14db   :  { %v995_v3 = vpop.permute.xlu1 %994 }
0x14dc   :  { %v997_v6 = vmul.f32 %v995_v3, %v992_v63 }
0x14de   :  { %v1001_v7 = vadd.f32 %v1000_v5, %v997_v6 }
0x14df   :  { %v444_v8 = vpop.permute.xlu1 %443 }
0x14e0   :  { %447 = vst.msk [vmem:[#allocation2] sm:$0x4] %vm446_vm6, %v444_v8  ;;  %1003 = vrot.lane.b32.xlu0 %v1001_v7, %s2596_s28 }
0x14e3   :  { %v668_v9 = vpop.permute.xlu1 %667 }
0x14e4   :  { %671 = vst.msk [vmem:[#allocation2] sm:$0x10] %vm670_vm7, %v668_v9 }
0x14e7   :  { %v892_v10 = vpop.permute.xlu1 %891 }
0x14e8   :  { %895 = vst.msk [vmem:[#allocation2] sm:$0x40] %vm894_vm8, %v892_v10 }
0x1533   :  { %v1168_v13 = vpop.f32.mrf.mxu0 }
0x1535   :  { %v2356_v16 = vpop.f32.mrf.mxu0 }
0x1552   :  { %v1004_v11 = vpop.permute.xlu0 %1003 }
0x1553   :  { %1007 = vst.msk [vmem:[#allocation2] sm:$0x80] %vm1006_vm9, %v1004_v11  ;;  %1008 = vst.msk [vmem:[#allocation5 - $0x7] sm:$0x80] %vm1006_vm9, %v1004_v11 }
0x155a   :  { %v1009_v12 = vld [vmem:[#allocation2] sm:$0xff] }
0x155b   :  { %2344 = vmatmul.mubr.msk.f32.vlgmr.msra.gmra.mxu1 %vm40_vm0, %v1009_v12 }
0x155c   :  { %2358 = vmatpush3.msra.mxu1 %v2868_v59  ;;  %2365 = vmatprep.mubr.msk.f32.mxu1 %vm2593_vm1, %v2592_v2 }
0x155d   :  { %2359 = vmatprep.subr.mxu1 %v2592_v2 }
0x155e   :  { %2360 = vmatpush3.msra.mxu1 %v2877_v15 }
0x155f   :  { %2361 = vmatprep.subr.mxu1 %v2592_v2 }
0x1560   :  { %2362 = vmatpush3.msra.mxu1 %v2887_v61 }
0x1561   :  { %2363 = vmatprep.subr.mxu1 %v2592_v2 }
0x1562   :  { %2364 = vmatpush3.msra.mxu1 %v2898_v1 }
0x1563   :  { %2379 = vmatprep.subr.mxu1 %v2592_v2 }
0x161b   :  { %v1089_v18 = vpop.f32.mrf.mxu1 }
0x161c   :  { %v2941_v19 = vadd.f32 %v2117_v17, %v1089_v18 }
0x161d   :  { %v2345_v20 = vpop.f32.mrf.mxu1 }
0x161e   :  { %v1172_v21 = vadd.f32 %v1168_v13, %v2941_v19 }
0x1620   :  { %1180 = vrot.lane.b32.xlu1 %v1172_v21, %s2594_s26  ;;  %v2124_v22 = vmul.f32 -1.442695, %v1172_v21 }
0x1622   :  { %2500 = vpow2.f32 %v2124_v22 }
0x162f   :  { %v2501_v23 = vpop.eup %2500 }
0x1630   :  { %v1176_v24 = vadd.f32 1.0, %v2501_v23 }
0x1632   :  { %2502 = vrcp.f32 %v1176_v24 }
0x163f   :  { %v2503_v25 = vpop.eup %2502 }
0x1640   :  { %v1190_v32 = vsub.f32 1.0, %v2503_v25 }
0x1692   :  { %v1181_v26 = vpop.permute.xlu1 %1180 }
0x1693   :  { %v1183_v27 = vmul.f32 %v2503_v25, %v1181_v26 }
0x1695   :  { %1185 = vrot.lane.b32.xlu0 %v1183_v27, %s2595_s27 }
0x1699   :  { %1196 = vrot.lane.b32.xlu0 %v1098_v4, %s2594_s26 }
0x1707   :  { %v1186_v28 = vpop.permute.xlu0 %1185 }
0x1708   :  { %v1188_v29 = vadd.f32 %v1186_v28, %v1172_v21 }
0x170a   :  { %2504 = vtanh.f32 %v1188_v29 }
0x170b   :  { %v1197_v31 = vpop.permute.xlu0 %1196 }
0x170c   :  { %v1199_v34 = vmul.f32 %v2503_v25, %v1197_v31 }
0x1717   :  { %v2505_v30 = vpop.eup %2504 }
0x1718   :  { %1192 = vrot.lane.b32.xlu1 %v2505_v30, %s2596_s28 }
0x178a   :  { %v1193_v33 = vpop.permute.xlu1 %1192 }
0x178b   :  { %v1195_v35 = vmul.f32 %v1193_v33, %v1190_v32 }
0x178d   :  { %v1200_v37 = vadd.f32 %v1199_v34, %v1195_v35 }
0x178f   :  { %1202 = vrot.lane.b32.xlu1 %v1200_v37, %s2596_s28  ;;  %v1305_v53 = vrot.slane %v1200_v37, 7 }
0x1801   :  { %v1203_v38 = vpop.permute.xlu1 %1202 }
0x1802   :  { %1205 = vst.msk [vmem:[#allocation2] sm:$0x1] %vm225_vm2, %v1203_v38  ;;  %2366 = vmatmul.mubr.msk.f32.vlgmr.msra.gmra.mxu1 %vm40_vm0, %v1203_v38 }
0x1803   :  { %2380 = vmatpush3.msra.mxu1 %v2868_v59  ;;  %2387 = vmatprep.mubr.msk.f32.mxu1 %vm2593_vm1, %v2592_v2 }
0x1804   :  { %2381 = vmatprep.subr.mxu1 %v2592_v2 }
0x1805   :  { %2382 = vmatpush3.msra.mxu1 %v2877_v15 }
0x1806   :  { %2383 = vmatprep.subr.mxu1 %v2592_v2 }
0x1807   :  { %2384 = vmatpush3.msra.mxu1 %v2887_v61 }
0x1808   :  { %2385 = vmatprep.subr.mxu1 %v2592_v2 }
0x1809   :  { %2386 = vmatpush3.msra.mxu1 %v2898_v1 }
0x180a   :  { %2401 = vmatprep.subr.mxu1 %v2592_v2 }
0x18c2   :  { %v1274_v39 = vpop.f32.mrf.mxu1 }
0x18c3   :  { %v1279_v40 = vrot.slane %v1274_v39, 7 }
0x18c4   :  { %v2367_v41 = vpop.f32.mrf.mxu1 }
0x18c5   :  { %v1281_v42 = vadd.f32 %v1279_v40, %v2941_v19 }
0x18c7   :  { %1289 = vrot.lane.b32.xlu0 %v1281_v42, %s2594_s26  ;;  %v2126_v43 = vmul.f32 -1.442695, %v1281_v42 }
0x18c9   :  { %2506 = vpow2.f32 %v2126_v43 }
0x18d6   :  { %v2507_v44 = vpop.eup %2506 }
0x18d7   :  { %v1285_v45 = vadd.f32 1.0, %v2507_v44 }
0x18d9   :  { %2508 = vrcp.f32 %v1285_v45 }
0x18e6   :  { %v2509_v46 = vpop.eup %2508 }
0x18e7   :  { %v1299_v14 = vsub.f32 1.0, %v2509_v46  ;;  %v1307_v56 = vmul.f32 %v2509_v46, %v1305_v53 }
0x1939   :  { %v1290_v47 = vpop.permute.xlu0 %1289 }
0x193a   :  { %v1292_v48 = vmul.f32 %v2509_v46, %v1290_v47 }
0x193c   :  { %1294 = vrot.lane.b32.xlu1 %v1292_v48, %s2595_s27 }
0x19ae   :  { %v1295_v49 = vpop.permute.xlu1 %1294 }
0x19af   :  { %v1297_v50 = vadd.f32 %v1295_v49, %v1281_v42 }
0x19b1   :  { %2510 = vtanh.f32 %v1297_v50 }
0x19be   :  { %v2511_v51 = vpop.eup %2510 }
0x19bf   :  { %1301 = vrot.lane.b32.xlu0 %v2511_v51, %s2596_s28 }
0x1a31   :  { %v1302_v54 = vpop.permute.xlu0 %1301 }
0x1a32   :  { %v1304_v55 = vmul.f32 %v1302_v54, %v1299_v14 }
0x1a34   :  { %v2965_v57 = vadd.f32 %v1307_v56, %v1304_v55 }
0x1a36   :  { %v1314_v52 = vrot.slane %v2965_v57, 1  ;;  %v1416_v12 = vrot.slane %v2965_v57, 7 }
0x1a38   :  { %1315 = vrot.lane.b32.xlu1 %v1314_v52, %s2596_s28 }
0x1aaa   :  { %v1316_v36 = vpop.permute.xlu1 %1315 }
0x1aab   :  { %2377 = vmatmul.mubr.msk.f32.vlgmr.msra.gmra.mxu0 %vm40_vm0, %v1316_v36 }
0x1aac   :  { %2391 = vmatpush3.msra.mxu0 %v2868_v59  ;;  %2398 = vmatprep.mubr.msk.f32.mxu0 %vm2593_vm1, %v2592_v2 }
0x1aad   :  { %2392 = vmatprep.subr.mxu0 %v2592_v2 }
0x1aae   :  { %2393 = vmatpush3.msra.mxu0 %v2877_v15 }
0x1aaf   :  { %2394 = vmatprep.subr.mxu0 %v2592_v2 }
0x1ab0   :  { %2395 = vmatpush3.msra.mxu0 %v2887_v61 }
0x1ab1   :  { %2396 = vmatprep.subr.mxu0 %v2592_v2 }
0x1ab2   :  { %2397 = vmatpush3.msra.mxu0 %v2898_v1 }
0x1ab3   :  { %2412 = vmatprep.subr.mxu0 %v2592_v2 }
0x1b6b   :  { %v1385_v60 = vpop.f32.mrf.mxu0 }
0x1b6c   :  { %v1390_v58 = vrot.slane %v1385_v60, 6 }
0x1b6d   :  { %v2378_v62 = vpop.f32.mrf.mxu0 }
0x1b6e   :  { %v1392_v63 = vadd.f32 %v1390_v58, %v2941_v19 }
0x1b70   :  { %1400 = vrot.lane.b32.xlu0 %v1392_v63, %s2594_s26  ;;  %v2128_v0 = vmul.f32 -1.442695, %v1392_v63 }
0x1b72   :  { %2512 = vpow2.f32 %v2128_v0 }
0x1b7f   :  { %v2513_v4 = vpop.eup %2512 }
0x1b80   :  { %v1396_v3 = vadd.f32 1.0, %v2513_v4 }
0x1b82   :  { %2514 = vrcp.f32 %v1396_v3 }
0x1b8f   :  { %v2515_v5 = vpop.eup %2514 }
0x1b90   :  { %v1410_v11 = vsub.f32 1.0, %v2515_v5  ;;  %v1418_v16 = vmul.f32 %v2515_v5, %v1416_v12 }
0x1be2   :  { %v1401_v6 = vpop.permute.xlu0 %1400 }
0x1be3   :  { %v1403_v7 = vmul.f32 %v2515_v5, %v1401_v6 }
0x1be5   :  { %1405 = vrot.lane.b32.xlu1 %v1403_v7, %s2595_s27 }
0x1c57   :  { %v1406_v8 = vpop.permute.xlu1 %1405 }
0x1c58   :  { %v1408_v9 = vadd.f32 %v1406_v8, %v1392_v63 }
0x1c5a   :  { %2516 = vtanh.f32 %v1408_v9 }
0x1c67   :  { %v2517_v10 = vpop.eup %2516 }
0x1c68   :  { %1412 = vrot.lane.b32.xlu0 %v2517_v10, %s2596_s28 }
0x1cda   :  { %v1413_v13 = vpop.permute.xlu0 %1412 }
0x1cdb   :  { %v1415_v17 = vmul.f32 %v1413_v13, %v1410_v11 }
0x1cdd   :  { %v2985_v18 = vadd.f32 %v1418_v16, %v1415_v17 }
0x1cdf   :  { %v1425_v20 = vrot.slane %v2985_v18, 2  ;;  %v1527_v37 = vrot.slane %v2985_v18, 7 }
0x1ce1   :  { %1426 = vrot.lane.b32.xlu1 %v1425_v20, %s2596_s28 }
0x1d53   :  { %v1427_v21 = vpop.permute.xlu1 %1426 }
0x1d54   :  { %2388 = vmatmul.mubr.msk.f32.vlgmr.msra.gmra.mxu1 %vm40_vm0, %v1427_v21 }
0x1d55   :  { %2402 = vmatpush3.msra.mxu1 %v2868_v59  ;;  %2409 = vmatprep.mubr.msk.f32.mxu1 %vm2593_vm1, %v2592_v2 }
0x1d56   :  { %2403 = vmatprep.subr.mxu1 %v2592_v2 }
0x1d57   :  { %2404 = vmatpush3.msra.mxu1 %v2877_v15 }
0x1d58   :  { %2405 = vmatprep.subr.mxu1 %v2592_v2 }
0x1d59   :  { %2406 = vmatpush3.msra.mxu1 %v2887_v61 }
0x1d5a   :  { %2407 = vmatprep.subr.mxu1 %v2592_v2 }
0x1d5b   :  { %2408 = vmatpush3.msra.mxu1 %v2898_v1 }
0x1d5c   :  { %2423 = vmatprep.subr.mxu1 %v2592_v2 }
0x1e14   :  { %v1496_v22 = vpop.f32.mrf.mxu1 }
0x1e15   :  { %v1501_v23 = vrot.slane %v1496_v22, 5 }
0x1e16   :  { %v2389_v24 = vpop.f32.mrf.mxu1 }
0x1e17   :  { %v1503_v25 = vadd.f32 %v1501_v23, %v2941_v19 }
0x1e19   :  { %1511 = vrot.lane.b32.xlu0 %v1503_v25, %s2594_s26  ;;  %v2130_v26 = vmul.f32 -1.442695, %v1503_v25 }
0x1e1b   :  { %2518 = vpow2.f32 %v2130_v26 }
0x1e28   :  { %v2519_v27 = vpop.eup %2518 }
0x1e29   :  { %v1507_v28 = vadd.f32 1.0, %v2519_v27 }
0x1e2b   :  { %2520 = vrcp.f32 %v1507_v28 }
0x1e38   :  { %v2521_v29 = vpop.eup %2520 }
0x1e39   :  { %v1521_v35 = vsub.f32 1.0, %v2521_v29  ;;  %v1529_v39 = vmul.f32 %v2521_v29, %v1527_v37 }
0x1e8b   :  { %v1512_v30 = vpop.permute.xlu0 %1511 }
0x1e8c   :  { %v1514_v31 = vmul.f32 %v2521_v29, %v1512_v30 }
0x1e8e   :  { %1516 = vrot.lane.b32.xlu1 %v1514_v31, %s2595_s27 }
0x1f00   :  { %v1517_v32 = vpop.permute.xlu1 %1516 }
0x1f01   :  { %v1519_v33 = vadd.f32 %v1517_v32, %v1503_v25 }
0x1f03   :  { %2522 = vtanh.f32 %v1519_v33 }
0x1f10   :  { %v2523_v34 = vpop.eup %2522 }
0x1f11   :  { %1523 = vrot.lane.b32.xlu0 %v2523_v34, %s2596_s28 }
0x1f83   :  { %v1524_v38 = vpop.permute.xlu0 %1523 }
0x1f84   :  { %v1526_v40 = vmul.f32 %v1524_v38, %v1521_v35 }
0x1f86   :  { %v3005_v41 = vadd.f32 %v1529_v39, %v1526_v40 }
0x1f88   :  { %v1536_v42 = vrot.slane %v3005_v41, 3  ;;  %v1638_v36 = vrot.slane %v3005_v41, 7 }
0x1f8a   :  { %1537 = vrot.lane.b32.xlu1 %v1536_v42, %s2596_s28 }
0x1ffc   :  { %v1538_v43 = vpop.permute.xlu1 %1537 }
0x1ffd   :  { %2399 = vmatmul.mubr.msk.f32.vlgmr.msra.gmra.mxu0 %vm40_vm0, %v1538_v43 }
0x1ffe   :  { %2413 = vmatpush3.msra.mxu0 %v2868_v59  ;;  %2420 = vmatprep.mubr.msk.f32.mxu0 %vm2593_vm1, %v2592_v2 }
0x1fff   :  { %2414 = vmatprep.subr.mxu0 %v2592_v2 }
0x2000   :  { %2415 = vmatpush3.msra.mxu0 %v2877_v15 }
0x2001   :  { %2416 = vmatprep.subr.mxu0 %v2592_v2 }
0x2002   :  { %2417 = vmatpush3.msra.mxu0 %v2887_v61 }
0x2003   :  { %2418 = vmatprep.subr.mxu0 %v2592_v2 }
0x2004   :  { %2419 = vmatpush3.msra.mxu0 %v2898_v1 }
0x2005   :  { %2434 = vmatprep.subr.mxu0 %v2592_v2 }
0x20bd   :  { %v1607_v44 = vpop.f32.mrf.mxu0 }
0x20be   :  { %v1612_v45 = vrot.slane %v1607_v44, 4 }
0x20bf   :  { %v2400_v46 = vpop.f32.mrf.mxu0 }
0x20c0   :  { %v1614_v47 = vadd.f32 %v1612_v45, %v2941_v19 }
0x20c2   :  { %1622 = vrot.lane.b32.xlu0 %v1614_v47, %s2594_s26  ;;  %v2132_v48 = vmul.f32 -1.442695, %v1614_v47 }
0x20c4   :  { %2524 = vpow2.f32 %v2132_v48 }
0x20d1   :  { %v2525_v49 = vpop.eup %2524 }
0x20d2   :  { %v1618_v50 = vadd.f32 1.0, %v2525_v49 }
0x20d4   :  { %2526 = vrcp.f32 %v1618_v50 }
0x20e1   :  { %v2527_v51 = vpop.eup %2526 }
0x20e2   :  { %v1632_v52 = vsub.f32 1.0, %v2527_v51  ;;  %v1640_v58 = vmul.f32 %v2527_v51, %v1638_v36 }
0x2134   :  { %v1623_v53 = vpop.permute.xlu0 %1622 }
0x2135   :  { %v1625_v14 = vmul.f32 %v2527_v51, %v1623_v53 }
0x2137   :  { %1627 = vrot.lane.b32.xlu1 %v1625_v14, %s2595_s27 }
0x21a9   :  { %v1628_v54 = vpop.permute.xlu1 %1627 }
0x21aa   :  { %v1630_v55 = vadd.f32 %v1628_v54, %v1614_v47 }
0x21ac   :  { %2528 = vtanh.f32 %v1630_v55 }
0x21b9   :  { %v2529_v56 = vpop.eup %2528 }
0x21ba   :  { %1634 = vrot.lane.b32.xlu0 %v2529_v56, %s2596_s28 }
0x222c   :  { %v1635_v60 = vpop.permute.xlu0 %1634 }
0x222d   :  { %v1637_v62 = vmul.f32 %v1635_v60, %v1632_v52 }
0x222f   :  { %v3025_v63 = vadd.f32 %v1640_v58, %v1637_v62 }
0x2231   :  { %v1647_v0 = vrot.slane %v3025_v63, 4  ;;  %v1749_v16 = vrot.slane %v3025_v63, 7 }
0x2233   :  { %1648 = vrot.lane.b32.xlu1 %v1647_v0, %s2596_s28 }
0x22a5   :  { %v1649_v4 = vpop.permute.xlu1 %1648 }
0x22a6   :  { %2410 = vmatmul.mubr.msk.f32.vlgmr.msra.gmra.mxu1 %vm40_vm0, %v1649_v4 }
0x22a7   :  { %2424 = vmatpush3.msra.mxu1 %v2868_v59  ;;  %2431 = vmatprep.mubr.msk.f32.mxu1 %vm2593_vm1, %v2592_v2 }
0x22a8   :  { %2425 = vmatprep.subr.mxu1 %v2592_v2 }
0x22a9   :  { %2426 = vmatpush3.msra.mxu1 %v2877_v15 }
0x22aa   :  { %2427 = vmatprep.subr.mxu1 %v2592_v2 }
0x22ab   :  { %2428 = vmatpush3.msra.mxu1 %v2887_v61 }
0x22ac   :  { %2429 = vmatprep.subr.mxu1 %v2592_v2 }
0x22ad   :  { %2430 = vmatpush3.msra.mxu1 %v2898_v1 }
0x2366   :  { %v1718_v3 = vpop.f32.mrf.mxu1 }
0x2367   :  { %v1723_v5 = vrot.slane %v1718_v3, 3 }
0x2368   :  { %v2411_v6 = vpop.f32.mrf.mxu1 }
0x2369   :  { %v1725_v59 = vadd.f32 %v1723_v5, %v2941_v19 }
0x236b   :  { %1733 = vrot.lane.b32.xlu0 %v1725_v59, %s2594_s26  ;;  %v2134_v7 = vmul.f32 -1.442695, %v1725_v59 }
0x236d   :  { %2530 = vpow2.f32 %v2134_v7 }
0x237a   :  { %v2531_v8 = vpop.eup %2530 }
0x237b   :  { %v1729_v9 = vadd.f32 1.0, %v2531_v8 }
0x237d   :  { %2532 = vrcp.f32 %v1729_v9 }
0x238a   :  { %v2533_v15 = vpop.eup %2532 }
0x238b   :  { %v1743_v13 = vsub.f32 1.0, %v2533_v15  ;;  %v1751_v20 = vmul.f32 %v2533_v15, %v1749_v16 }
0x23dd   :  { %v1734_v10 = vpop.permute.xlu0 %1733 }
0x23de   :  { %v1736_v11 = vmul.f32 %v2533_v15, %v1734_v10 }
0x23e0   :  { %1738 = vrot.lane.b32.xlu1 %v1736_v11, %s2595_s27 }
0x2452   :  { %v1739_v61 = vpop.permute.xlu1 %1738 }
0x2453   :  { %v1741_v12 = vadd.f32 %v1739_v61, %v1725_v59 }
0x2455   :  { %2534 = vtanh.f32 %v1741_v12 }
0x2462   :  { %v2535_v1 = vpop.eup %2534 }
0x2463   :  { %1745 = vrot.lane.b32.xlu0 %v2535_v1, %s2596_s28 }
0x24d5   :  { %v1746_v17 = vpop.permute.xlu0 %1745 }
0x24d6   :  { %v1748_v21 = vmul.f32 %v1746_v17, %v1743_v13 }
0x24d8   :  { %v1752_v22 = vadd.f32 %v1751_v20, %v1748_v21 }
0x24da   :  { %v1758_v23 = vrot.slane %v1752_v22, 5  ;;  %v1860_v40 = vrot.slane %v1752_v22, 7 }
0x24dc   :  { %1759 = vrot.lane.b32.xlu1 %v1758_v23, %s2596_s28 }
0x254e   :  { %v1760_v24 = vpop.permute.xlu1 %1759 }
0x254f   :  { %2421 = vmatmul.mubr.msk.f32.vlgmr.msra.gmra.mxu0 %vm40_vm0, %v1760_v24 }
0x2550   :  { %2442 = vmatprep.mubr.msk.f32.mxu0 %vm2593_vm1, %v2592_v2 }
0x260f   :  { %v1829_v25 = vpop.f32.mrf.mxu0 }
0x2610   :  { %v1834_v26 = vrot.slane %v1829_v25, 2 }
0x2611   :  { %v2422_v27 = vpop.f32.mrf.mxu0 }
0x2612   :  { %v1836_v28 = vadd.f32 %v1834_v26, %v2941_v19 }
0x2614   :  { %1844 = vrot.lane.b32.xlu0 %v1836_v28, %s2594_s26  ;;  %v2136_v29 = vmul.f32 -1.442695, %v1836_v28 }
0x2616   :  { %2536 = vpow2.f32 %v2136_v29 }
0x2623   :  { %v2537_v30 = vpop.eup %2536 }
0x2624   :  { %v1840_v31 = vadd.f32 1.0, %v2537_v30 }
0x2626   :  { %2538 = vrcp.f32 %v1840_v31 }
0x2633   :  { %v2539_v32 = vpop.eup %2538 }
0x2634   :  { %v1854_v39 = vsub.f32 1.0, %v2539_v32  ;;  %v1862_v43 = vmul.f32 %v2539_v32, %v1860_v40 }
0x2686   :  { %v1845_v33 = vpop.permute.xlu0 %1844 }
0x2687   :  { %v1847_v34 = vmul.f32 %v2539_v32, %v1845_v33 }
0x2689   :  { %1849 = vrot.lane.b32.xlu1 %v1847_v34, %s2595_s27 }
0x26fb   :  { %v1850_v35 = vpop.permute.xlu1 %1849 }
0x26fc   :  { %v1852_v37 = vadd.f32 %v1850_v35, %v1836_v28 }
0x26fe   :  { %2540 = vtanh.f32 %v1852_v37 }
0x270b   :  { %v2541_v38 = vpop.eup %2540 }
0x270c   :  { %1856 = vrot.lane.b32.xlu0 %v2541_v38, %s2596_s28 }
0x277e   :  { %v1857_v42 = vpop.permute.xlu0 %1856 }
0x277f   :  { %v1859_v44 = vmul.f32 %v1857_v42, %v1854_v39 }
0x2781   :  { %v1863_v45 = vadd.f32 %v1862_v43, %v1859_v44 }
0x2783   :  { %v1869_v46 = vrot.slane %v1863_v45, 6  ;;  %v1971_v3 = vrot.slane %v1863_v45, 7 }
0x2785   :  { %1870 = vrot.lane.b32.xlu1 %v1869_v46, %s2596_s28 }
0x27f7   :  { %v1871_v47 = vpop.permute.xlu1 %1870 }
0x27f8   :  { %2432 = vmatmul.mubr.msk.f32.vlgmr.msra.gmra.mxu1 %vm40_vm0, %v1871_v47 }
0x28b8   :  { %v1940_v48 = vpop.f32.mrf.mxu1 }
0x28b9   :  { %v1945_v49 = vrot.slane %v1940_v48, 1 }
0x28ba   :  { %v2433_v50 = vpop.f32.mrf.mxu1 }
0x28bb   :  { %v1947_v51 = vadd.f32 %v1945_v49, %v2941_v19 }
0x28bd   :  { %1955 = vrot.lane.b32.xlu0 %v1947_v51, %s2594_s26  ;;  %v2138_v53 = vmul.f32 -1.442695, %v1947_v51 }
0x28bf   :  { %2542 = vpow2.f32 %v2138_v53 }
0x28cc   :  { %v2543_v14 = vpop.eup %2542 }
0x28cd   :  { %v1951_v54 = vadd.f32 1.0, %v2543_v14 }
0x28cf   :  { %2544 = vrcp.f32 %v1951_v54 }
0x28dc   :  { %v2545_v55 = vpop.eup %2544 }
0x28dd   :  { %v1965_v4 = vsub.f32 1.0, %v2545_v55  ;;  %v1973_v6 = vmul.f32 %v2545_v55, %v1971_v3 }
0x292f   :  { %v1956_v56 = vpop.permute.xlu0 %1955 }
0x2930   :  { %v1958_v52 = vmul.f32 %v2545_v55, %v1956_v56 }
0x2932   :  { %1960 = vrot.lane.b32.xlu1 %v1958_v52, %s2595_s27 }
0x2936   :  { %1310 = vrot.lane.b32.xlu1 %v2965_v57, %s2596_s28  ;;  %v1985_v57 = vld [vmem:[%s3107_s5 + $0x18] sm:$0xff] }
0x2937   :  { %2435 = vmatpush3.msra.mxu0 %v1985_v57 }
0x2938   :  { %2436 = vmatprep.subr.mxu0 %v2592_v2 }
0x293a   :  { %1532 = vrot.lane.b32.xlu1 %v3005_v41, %s2596_s28  ;;  %v1984_v41 = vld [vmem:[%s3107_s5 + $0x10] sm:$0xff] }
0x293b   :  { %2437 = vmatpush3.msra.mxu0 %v1984_v41 }
0x293c   :  { %2438 = vmatprep.subr.mxu0 %v2592_v2 }
0x293e   :  { %1754 = vrot.lane.b32.xlu1 %v1752_v22, %s2596_s28 }
0x29a4   :  { %v1961_v19 = vpop.permute.xlu1 %1960 }
0x29a5   :  { %v1963_v36 = vadd.f32 %v1961_v19, %v1947_v51 }
0x29a7   :  { %2546 = vtanh.f32 %v1963_v36 }
0x29a8   :  { %v1311_v60 = vpop.permute.xlu1 %1310 }
0x29a9   :  { %1313 = vst.msk [vmem:[#allocation2] sm:$0x2] %vm334_vm3, %v1311_v60 }
0x29ac   :  { %v1533_v58 = vpop.permute.xlu1 %1532 }
0x29ad   :  { %1535 = vst.msk [vmem:[#allocation2] sm:$0x8] %vm558_vm4, %v1533_v58 }
0x29b0   :  { %v1755_v62 = vpop.permute.xlu1 %1754 }
0x29b1   :  { %1757 = vst.msk [vmem:[#allocation2] sm:$0x20] %vm782_vm5, %v1755_v62 }
0x29b4   :  { %v2547_v0 = vpop.eup %2546 }
0x29b5   :  { %1967 = vrot.lane.b32.xlu0 %v2547_v0, %s2596_s28 }
0x29b9   :  { %1421 = vrot.lane.b32.xlu0 %v2985_v18, %s2596_s28  ;;  %v1983_v18 = vld [vmem:[%s3107_s5 + $0x8] sm:$0xff] }
0x29ba   :  { %2439 = vmatpush3.msra.mxu0 %v1983_v18 }
0x29bb   :  { %2440 = vmatprep.subr.mxu0 %v2592_v2 }
0x29bd   :  { %1643 = vrot.lane.b32.xlu0 %v3025_v63, %s2596_s28  ;;  %v1982_v63 = vld [vmem:[%s3107_s5] sm:$0xff]  ;;  %s2597_s5 = smov [#allocation5]  }
0x29be   :  { %2441 = vmatpush3.msra.mxu0 %v1982_v63  ;;  %s2083_s9 = sshll.u32 %s2597_s5, 4  ;;  %s2084_s9 = int_to_ptr.vmem [resolvable:$true] %s2083_s9 }
0x29bf   :  { %s2548_s10 = scalar_lea.vmem %s2084_s9, 32  ;;  %p2553_p1 = scmp.lt.s32.totalorder %s2084_s9, %s2084_s9 }
0x29c0   :  { %p2549_p0 = scmp.ne.s32.totalorder %s2084_s9, %s2548_s10  ;;  %p2554_p2 = scmp.lt.s32.totalorder %s2548_s10, %s2548_s10 }
0x29c1   :  { %1865 = vrot.lane.b32.xlu0 %v1863_v45, %s2596_s28 }
0x29c2   :  { %p2555_p3 = por %p2554_p2, %p2553_p1 }
0x29c4   :  { %p2556_p4 = pnand %p2555_p3, %p2549_p0 }
0x2a27   :  { %v1968_v5 = vpop.permute.xlu0 %1967 }
0x2a28   :  { %v1970_v59 = vmul.f32 %v1968_v5, %v1965_v4 }
0x2a2a   :  { %v1974_v7 = vadd.f32 %v1973_v6, %v1970_v59 }
0x2a2b   :  { %v1422_v8 = vpop.permute.xlu0 %1421 }
0x2a2c   :  { %1424 = vst.msk [vmem:[#allocation2] sm:$0x4] %vm446_vm6, %v1422_v8  ;;  %1976 = vrot.lane.b32.xlu1 %v1974_v7, %s2596_s28 }
0x2a2f   :  { %v1644_v9 = vpop.permute.xlu0 %1643 }
0x2a30   :  { %1646 = vst.msk [vmem:[#allocation2] sm:$0x10] %vm670_vm7, %v1644_v9 }
0x2a33   :  { %v1866_v15 = vpop.permute.xlu0 %1865 }
0x2a34   :  { %1868 = vst.msk [vmem:[#allocation2] sm:$0x40] %vm894_vm8, %v1866_v15 }
0x2a9e   :  { %v1977_v10 = vpop.permute.xlu1 %1976 }
0x2a9f   :  { %1979 = vst.msk [vmem:[#allocation2] sm:$0x80] %vm1006_vm9, %v1977_v10  ;;  %1980 = vst.msk [vmem:[#allocation5 - $0x6] sm:$0x80] %vm1006_vm9, %v1977_v10 }
0x2aa6   :  { %v1981_v2 = vld [vmem:[#allocation2] sm:$0xff] }
0x2aa7   :  { %2443 = vmatmul.mubr.msk.f32.vlgmr.msra.gmra.mxu0 %vm40_vm0, %v1981_v2 }
0x2aa8   :  { %2559 = shalt.err (!%p2556_p4)
}
0x2aa9   :  { %2086 = dma.vmem_to_hbm [thread:$0]  %s2084_s9, 32, %s3110_s8, [#allocation6]   ;;  %v2139_v11 = vld [vmem:[%s3108_s6] ss:$0 sm:$0xff] }
0x2aaa   :  { %s2598_s14 = smov [#allocation3]  }
0x2aab   :  { %s2073_s15 = sshll.u32 %s2598_s14, 4  ;;  %s2074_s15 = int_to_ptr.vmem [resolvable:$true] %s2073_s15 }
0x2aac   :  { %s2568_s16 = scalar_lea.vmem %s2074_s15, 128  ;;  %p2573_p6 = scmp.lt.s32.totalorder %s2074_s15, %s2074_s15 }
0x2aad   :  { %p2569_p5 = scmp.ne.s32.totalorder %s2074_s15, %s2568_s16  ;;  %p2574_p7 = scmp.lt.s32.totalorder %s2568_s16, %s2568_s16 }
0x2aaf   :  { %p2575_p8 = por %p2574_p7, %p2573_p6 }
0x2ab1   :  { %p2576_p9 = pnand %p2575_p8, %p2569_p5 }
0x2b67   :  { %v2062_v61 = vpop.f32.mrf.mxu0 }
0x2b68   :  { %v2063_v12 = vadd.f32 %v2139_v11, %v2062_v61 }
0x2b69   :  { %v2444_v1 = vpop.f32.mrf.mxu0 }
0x2b6a   :  { %2066 = vst [vmem:[#allocation3] sm:$0xff] %v2063_v12 }
0x2b6b   :  { %2579 = shalt.err (!%p2576_p9)
}
0x2b6c   :  { %2076 = dma.vmem_to_hbm [thread:$0]  %s2074_s15, 128, %s3109_s7, [#allocation4]  }
0x2b6d   :  { %2588 = dma.done.wait [#allocation4], 128  }
0x2b6e   :  { %2589 = vsyncadd [#allocation4], 4294967168 }
0x2b6f   :  { %2590 = dma.done.wait [#allocation6], 32  }
0x2b70   :  { %2591 = vsyncadd [#allocation6], 4294967264 }
0x2b71   :  { %2093 = vsyncpa [#allocation4], 1 }
0x2b72   :  { %2094 = vsyncpa [#allocation6], 1 }

</bundles_post_ra>
